<compile_context>
chip_gen: v5e
topology: v5e:2x2
jax: 0.10.0
libtpu: 0.0.40
codegen_flags: <defaults>
</compile_context>

<pallas_src>
import functools

import jax
import jax.numpy as jnp
from jax.experimental import pallas as pl
from jax.experimental.pallas import tpu as pltpu


def _round_up(v, m):
    return (v + m - 1) // m * m


def _vmem_capacity_bytes():
    try:
        return int(pltpu.get_tpu_info().vmem_capacity_bytes)
    except Exception:
        return 64 * 2**20   # conservative fallback: v7x per-TensorCore VMEM


def _netbio_kernel(n_k_chunks,
                   x_ref,            # (TILE_B, K_TILE) bf16  -- chunk of x along features
                   w1_ref, b1_ref,   # W1 chunk (K_TILE, n_hid_p) bf16 / b1 (1, n_hid_p) f32
                   w2_ref, b2_ref,   # resident (n_hid_p, n_out_p) bf16 / (1, n_out_p) f32
                   w3_ref, b3_ref,   # resident (n_out_p, n_hid_p) bf16 / (1, n_hid_p) f32
                   w4_ref, b4_ref,   # W4 chunk (n_hid_p, K_TILE) bf16 / b4 chunk (1, K_TILE) f32
                   enc_ref, dec_ref,                 # bf16 outputs
                   h1_acc, h2_scr):                  # scratch: f32 / bf16 (TILE_B, n_hid_p)
    C = n_k_chunks
    s = pl.program_id(1)

    @pl.when(s == 0)
    def _():
        h1_acc[...] = jnp.zeros_like(h1_acc)

    # ---- phase 1 (s < C): stream W1 along K (= n_inputs), accumulate in f32 ----
    @pl.when(s < C)
    def _():
        h1_acc[...] += jnp.dot(x_ref[...], w1_ref[...],
                               preferred_element_type=jnp.float32)

    # ---- end of phase 1: bias+ReLU, encoder layer 2, decoder hidden layer ----
    @pl.when(s == C - 1)
    def _():
        h1 = jnp.maximum(h1_acc[...] + b1_ref[...], 0.0).astype(jnp.bfloat16)
        enc = jnp.dot(h1, w2_ref[...],
                      preferred_element_type=jnp.float32) + b2_ref[...]
        enc_ref[...] = enc.astype(enc_ref.dtype)
        h2 = jnp.maximum(
            jnp.dot(enc.astype(jnp.bfloat16), w3_ref[...],
                    preferred_element_type=jnp.float32) + b3_ref[...], 0.0)
        h2_scr[...] = h2.astype(h2_scr.dtype)

    # ---- phase 2 (s >= C): stream W4 along N (= n_inputs), emit decode slices ----
    @pl.when(s >= C)
    def _():
        dec = jnp.dot(h2_scr[...], w4_ref[...],
                      preferred_element_type=jnp.float32) + b4_ref[...]
        dec_ref[...] = dec.astype(dec_ref.dtype)


def prepare_params(params):
    """One-time parameter prep (do NOT call per forward pass).

    Transposes PyTorch [out, in] weights to [in, out], zero-pads every feature
    dim to a multiple of 128 (lane-dense), casts weights to bf16 and keeps
    biases in f32 with shape (1, out_p). Zero padding is exact."""
    w1, b1 = params["enc_l1"]
    w2, b2 = params["enc_l2"]
    w3, b3 = params["dec_l1"]
    w4, b4 = params["dec_l2"]
    n_hidden, n_inputs = w1.shape
    n_outputs = w2.shape[0]

    n_in_p = _round_up(n_inputs, 128)
    n_hid_p = _round_up(n_hidden, 128)
    n_out_p = _round_up(n_outputs, 128)

    def pad_wt(w, in_p, out_p):
        wt = w.T.astype(jnp.bfloat16)                # [in, out]
        buf = jnp.zeros((in_p, out_p), jnp.bfloat16)
        return buf.at[:wt.shape[0], :wt.shape[1]].set(wt)

    def pad_b(b, out_p):
        buf = jnp.zeros((1, out_p), jnp.float32)
        return buf.at[0, :b.shape[0]].set(b.astype(jnp.float32))

    return {
        "w1": pad_wt(w1, n_in_p, n_hid_p), "b1": pad_b(b1, n_hid_p),
        "w2": pad_wt(w2, n_hid_p, n_out_p), "b2": pad_b(b2, n_out_p),
        "w3": pad_wt(w3, n_out_p, n_hid_p), "b3": pad_b(b3, n_hid_p),
        "w4": pad_wt(w4, n_hid_p, n_in_p), "b4": pad_b(b4, n_in_p),
    }


@functools.partial(jax.jit, static_argnames=("n_inputs", "n_outputs"))
def netbio_forward(x, prepped, *, n_inputs, n_outputs):
    """netBio forward. x: [B, n_inputs] f32. Returns (encode, decode) in f32."""
    w1, b1 = prepped["w1"], prepped["b1"]
    w2, b2 = prepped["w2"], prepped["b2"]
    w3, b3 = prepped["w3"], prepped["b3"]
    w4, b4 = prepped["w4"], prepped["b4"]

    n_in_p, n_hid_p = w1.shape
    n_out_p = w2.shape[1]
    B = x.shape[0]

    # Streamed-weight tile along n_inputs: prefer 512/256 (full v6e/v7x MXU pass).
    k_tile = next(t for t in (512, 256, 128) if n_in_p % t == 0)
    C = n_in_p // k_tile

    cap = _vmem_capacity_bytes()
    budget = int(0.8 * cap)
    resident_bytes = sum(int(a.size) * a.dtype.itemsize
                         for a in (b1, w2, b2, w3, b3))

    def vmem_need(tb):
        per_step = (tb * k_tile * 2          # x chunk (bf16)
                    + k_tile * n_hid_p * 2   # W1 chunk (bf16)
                    + n_hid_p * k_tile * 2   # W4 chunk (bf16)
                    + k_tile * 4             # b4 chunk (f32)
                    + tb * n_out_p * 2       # enc out block (bf16)
                    + tb * k_tile * 2)       # dec out block (bf16)
        scratch = tb * n_hid_p * (4 + 2)     # h1_acc f32 + h2 bf16
        return resident_bytes + 2 * per_step + scratch   # 2x = double-buffered pipeline

    # Generation-aware batch tile: largest of {512,256,128} that fits the budget.
    b_cap = _round_up(B, 128)
    TILE_B = 128
    for tb in (512, 256, 128):
        if tb <= b_cap and vmem_need(tb) <= budget:
            TILE_B = tb
            break
    B_pad = _round_up(B, TILE_B)
    n_btiles = B_pad // TILE_B

    # Fast path: skip the padding round-trip when already aligned.
    if B_pad == B and n_in_p == n_inputs:
        x_p = x.astype(jnp.bfloat16)
    else:
        x_p = jnp.zeros((B_pad, n_in_p), jnp.bfloat16).at[:B, :n_inputs].set(
            x.astype(jnp.bfloat16))

    # Small operands stay whole-array VMEM resident (single copy, no double-buffer).
    resident = pl.BlockSpec(memory_space=pltpu.MemorySpace.VMEM)

    in_specs = [
        pl.BlockSpec((TILE_B, k_tile), lambda i, s: (i, jnp.minimum(s, C - 1))),   # x chunk
        pl.BlockSpec((k_tile, n_hid_p), lambda i, s: (jnp.minimum(s, C - 1), 0)),  # W1 chunk
        resident,                                                                  # b1
        resident,                                                                  # W2
        resident,                                                                  # b2
        resident,                                                                  # W3
        resident,                                                                  # b3
        pl.BlockSpec((n_hid_p, k_tile), lambda i, s: (0, jnp.maximum(s - C, 0))),  # W4 chunk
        pl.BlockSpec((1, k_tile), lambda i, s: (0, jnp.maximum(s - C, 0))),        # b4 chunk
    ]
    out_specs = (
        pl.BlockSpec((TILE_B, n_out_p), lambda i, s: (i, 0)),                      # encode
        pl.BlockSpec((TILE_B, k_tile), lambda i, s: (i, jnp.maximum(s - C, 0))),   # decode
    )
    scratch_shapes = [
        pltpu.VMEM((TILE_B, n_hid_p), jnp.float32),    # h1 accumulator
        pltpu.VMEM((TILE_B, n_hid_p), jnp.bfloat16),   # h2 (decoder hidden)
    ]

    # Only shard the batch across megacore TCs when the per-core MXU work can
    # plausibly cover the (duplicated) weight DMA; otherwise keep it "arbitrary".
    batch_parallel = (n_btiles >= 2) and (B_pad >= 512)
    dims = ("parallel" if batch_parallel else "arbitrary", "arbitrary")

    need = vmem_need(TILE_B)
    vmem_limit = int(min(budget, max(2 * need + (8 << 20), 32 << 20)))

    flops = 2 * B_pad * (n_in_p * n_hid_p + n_hid_p * n_out_p
                         + n_out_p * n_hid_p + n_hid_p * n_in_p)
    weight_bytes = sum(int(a.size) * a.dtype.itemsize
                       for a in (w1, b1, w2, b2, w3, b3, w4, b4))
    bytes_accessed = (B_pad * n_in_p * 2 + weight_bytes
                      + B_pad * n_out_p * 2 + B_pad * n_in_p * 2)

    def kernel(*refs):
        _netbio_kernel(C, *refs)

    enc_p, dec_p = pl.pallas_call(
        kernel,
        out_shape=(
            jax.ShapeDtypeStruct((B_pad, n_out_p), jnp.bfloat16),
            jax.ShapeDtypeStruct((B_pad, n_in_p), jnp.bfloat16),
        ),
        grid=(n_btiles, 2 * C),
        in_specs=in_specs,
        out_specs=out_specs,
        scratch_shapes=scratch_shapes,
        compiler_params=pltpu.CompilerParams(
            dimension_semantics=dims,
            vmem_limit_bytes=vmem_limit,
        ),
        cost_estimate=pl.CostEstimate(
            flops=int(flops), transcendentals=0,
            bytes_accessed=int(bytes_accessed)),
    )(x_p, w1, b1, w2, b2, w3, b3, w4, b4)

    enc = enc_p if (B_pad == B and n_out_p == n_outputs) else enc_p[:B, :n_outputs]
    dec = dec_p if (B_pad == B and n_in_p == n_inputs) else dec_p[:B, :n_inputs]
    return enc.astype(jnp.float32), dec.astype(jnp.float32)


def init_params(key, n_inputs, n_outputs, n_hidden):
    """Deterministic init mimicking PyTorch nn.Linear default
    (uniform(-1/sqrt(fan_in), 1/sqrt(fan_in))), PyTorch [out, in] layout."""
    def linear(k, fan_in, fan_out):
        kw, kb = jax.random.split(k)
        bound = 1.0 / jnp.sqrt(fan_in)
        w = jax.random.uniform(kw, (fan_out, fan_in), jnp.float32, -bound, bound)
        b = jax.random.uniform(kb, (fan_out,), jnp.float32, -bound, bound)
        return w, b

    k1, k2, k3, k4 = jax.random.split(key, 4)
    return {
        "enc_l1": linear(k1, n_inputs, n_hidden),
        "enc_l2": linear(k2, n_hidden, n_outputs),
        "dec_l1": linear(k3, n_outputs, n_hidden),
        "dec_l2": linear(k4, n_hidden, n_inputs),
    }


def netbio_reference(x, params):
    """Pure-JAX f32 reference matching the PyTorch module."""
    w1, b1 = params["enc_l1"]
    w2, b2 = params["enc_l2"]
    w3, b3 = params["dec_l1"]
    w4, b4 = params["dec_l2"]
    h1 = jnp.maximum(x @ w1.T + b1, 0.0)
    enc = h1 @ w2.T + b2
    h2 = jnp.maximum(enc @ w3.T + b3, 0.0)
    dec = h2 @ w4.T + b4
    return enc, dec


if __name__ == "__main__":
    # netBio(n_inputs=300, n_outputs=2, n_hidden=300): module-default hidden size,
    # n_inputs chosen so the streamed W1/W4 path runs with C=3 feature chunks.
    B, n_inputs, n_outputs, n_hidden = 8, 300, 2, 300

    key = jax.random.PRNGKey(0)
    kx, kp = jax.random.split(key)
    x = jax.random.normal(kx, (B, n_inputs), jnp.float32)
    params = init_params(kp, n_inputs, n_outputs, n_hidden)
    prepped = prepare_params(params)   # one-time: transpose + pad + bf16 cast

    enc, dec = netbio_forward(x, prepped, n_inputs=n_inputs, n_outputs=n_outputs)
    jax.block_until_ready((enc, dec))

    enc_ref, dec_ref = netbio_reference(x, params)
    assert enc.shape == (B, n_outputs) and dec.shape == (B, n_inputs)
    # bf16 MXU inputs / bf16 outputs (f32 accumulation) vs f32 reference.
    assert jnp.allclose(enc, enc_ref, atol=5e-2, rtol=5e-2), float(jnp.max(jnp.abs(enc - enc_ref)))
    assert jnp.allclose(dec, dec_ref, atol=5e-2, rtol=5e-2), float(jnp.max(jnp.abs(dec - dec_ref)))

    print("KERNEL_OK")
</pallas_src>

<mosaic_0001>
module attributes {stable_mosaic.version = 11 : i64} {
  func.func @kernel(%arg0: i32, %arg1: i32, %arg2: memref<128x128xbf16, #tpu.memory_space<vmem>>, %arg3: memref<128x384xbf16, #tpu.memory_space<vmem>>, %arg4: memref<1x384xf32, #tpu.memory_space<vmem>>, %arg5: memref<384x128xbf16, #tpu.memory_space<vmem>>, %arg6: memref<1x128xf32, #tpu.memory_space<vmem>>, %arg7: memref<128x384xbf16, #tpu.memory_space<vmem>>, %arg8: memref<1x384xf32, #tpu.memory_space<vmem>>, %arg9: memref<384x128xbf16, #tpu.memory_space<vmem>>, %arg10: memref<1x128xf32, #tpu.memory_space<vmem>>, %arg11: memref<128x128xbf16, #tpu.memory_space<vmem>>, %arg12: memref<128x128xbf16, #tpu.memory_space<vmem>>, %arg13: memref<128x384xf32, #tpu.memory_space<vmem>>, %arg14: memref<128x384xbf16, #tpu.memory_space<vmem>>) attributes {dimension_semantics = [#tpu.dimension_semantics<arbitrary>, #tpu.dimension_semantics<arbitrary>], iteration_bounds = array<i64: 1, 6>, scalar_prefetch = 0 : i64, scratch_operands = 2 : i64, tpu.core_type = #tpu.core_type<tc>, window_params = [{transform_indices = @transform_0, window_bounds = array<i64: 128, 128>}, {transform_indices = @transform_1, window_bounds = array<i64: 128, 384>}, {pipeline_mode = #tpu.pipeline_mode<synchronous>, transform_indices = @transform_2, window_bounds = array<i64: 1, 384>}, {pipeline_mode = #tpu.pipeline_mode<synchronous>, transform_indices = @transform_3, window_bounds = array<i64: 384, 128>}, {pipeline_mode = #tpu.pipeline_mode<synchronous>, transform_indices = @transform_4, window_bounds = array<i64: 1, 128>}, {pipeline_mode = #tpu.pipeline_mode<synchronous>, transform_indices = @transform_5, window_bounds = array<i64: 128, 384>}, {pipeline_mode = #tpu.pipeline_mode<synchronous>, transform_indices = @transform_6, window_bounds = array<i64: 1, 384>}, {transform_indices = @transform_7, window_bounds = array<i64: 384, 128>}, {transform_indices = @transform_8, window_bounds = array<i64: 1, 128>}, {transform_indices = @transform_9, window_bounds = array<i64: 128, 128>}, {transform_indices = @transform_10, window_bounds = array<i64: 128, 128>}]} {
    %c0_i32 = arith.constant 0 : i32
    %0 = arith.cmpi eq, %arg1, %c0_i32 : i32
    %1 = arith.extui %0 : i1 to i32
    %c0_i32_0 = arith.constant 0 : i32
    %2 = arith.cmpi ne, %1, %c0_i32_0 : i32
    scf.if %2 {
      %cst = arith.constant 0.000000e+00 : f32
      %12 = vector.broadcast %cst : f32 to vector<128x384xf32>
      %c0 = arith.constant 0 : index
      %c0_5 = arith.constant 0 : index
      %13 = vector.load %arg13[%c0, %c0_5] : memref<128x384xf32, #tpu.memory_space<vmem>>, vector<128x384xf32>
      tpu.vector_store %arg13[%c0, %c0_5], %12 {strides = array<i32>} : memref<128x384xf32, #tpu.memory_space<vmem>>, vector<128x384xf32>,
    } else {
    }
    %c3_i32 = arith.constant 3 : i32
    %3 = arith.cmpi slt, %arg1, %c3_i32 : i32
    %4 = arith.extui %3 : i1 to i32
    %c0_i32_1 = arith.constant 0 : i32
    %5 = arith.cmpi ne, %4, %c0_i32_1 : i32
    scf.if %5 {
      %c0 = arith.constant 0 : index
      %c0_5 = arith.constant 0 : index
      %12 = vector.load %arg13[%c0, %c0_5] : memref<128x384xf32, #tpu.memory_space<vmem>>, vector<128x384xf32>
      %c0_6 = arith.constant 0 : index
      %c0_7 = arith.constant 0 : index
      %13 = vector.load %arg2[%c0_6, %c0_7] : memref<128x128xbf16, #tpu.memory_space<vmem>>, vector<128x128xbf16>
      %c0_8 = arith.constant 0 : index
      %c0_9 = arith.constant 0 : index
      %14 = vector.load %arg3[%c0_8, %c0_9] : memref<128x384xbf16, #tpu.memory_space<vmem>>, vector<128x384xbf16>
      %cst = arith.constant dense<0.000000e+00> : vector<128x384xf32>
      %15 = tpu.matmul %13, %14, %cst {dimension_numbers = #tpu.dot_dimension_numbers<[1], [0], [0], [1], [0, 0, 1, 1], [], []>} : vector<128x128xbf16>, vector<128x384xbf16>, vector<128x384xf32> -> vector<128x384xf32>
      %16 = arith.addf %12, %15 : vector<128x384xf32>
      %c0_10 = arith.constant 0 : index
      %c0_11 = arith.constant 0 : index
      %17 = vector.load %arg13[%c0_10, %c0_11] : memref<128x384xf32, #tpu.memory_space<vmem>>, vector<128x384xf32>
      tpu.vector_store %arg13[%c0_10, %c0_11], %16 {strides = array<i32>} : memref<128x384xf32, #tpu.memory_space<vmem>>, vector<128x384xf32>,
    } else {
    }
    %c2_i32 = arith.constant 2 : i32
    %6 = arith.cmpi eq, %arg1, %c2_i32 : i32
    %7 = arith.extui %6 : i1 to i32
    %c0_i32_2 = arith.constant 0 : i32
    %8 = arith.cmpi ne, %7, %c0_i32_2 : i32
    scf.if %8 {
      %c0 = arith.constant 0 : index
      %c0_5 = arith.constant 0 : index
      %12 = vector.load %arg13[%c0, %c0_5] : memref<128x384xf32, #tpu.memory_space<vmem>>, vector<128x384xf32>
      %c0_6 = arith.constant 0 : index
      %c0_7 = arith.constant 0 : index
      %13 = vector.load %arg4[%c0_6, %c0_7] : memref<1x384xf32, #tpu.memory_space<vmem>>, vector<1x384xf32>
      %14 = vector.broadcast %13 : vector<1x384xf32> to vector<128x384xf32>
      %15 = arith.addf %12, %14 : vector<128x384xf32>
      %cst = arith.constant 0.000000e+00 : f32
      %16 = vector.broadcast %cst : f32 to vector<128x384xf32>
      %17 = arith.maximumf %15, %16 : vector<128x384xf32>
      %18 = arith.truncf %17 : vector<128x384xf32> to vector<128x384xbf16>
      %c0_8 = arith.constant 0 : index
      %c0_9 = arith.constant 0 : index
      %19 = vector.load %arg5[%c0_8, %c0_9] : memref<384x128xbf16, #tpu.memory_space<vmem>>, vector<384x128xbf16>
      %cst_10 = arith.constant dense<0.000000e+00> : vector<128x128xf32>
      %20 = tpu.matmul %18, %19, %cst_10 {dimension_numbers = #tpu.dot_dimension_numbers<[1], [0], [0], [1], [0, 0, 1, 1], [], []>} : vector<128x384xbf16>, vector<384x128xbf16>, vector<128x128xf32> -> vector<128x128xf32>
      %c0_11 = arith.constant 0 : index
      %c0_12 = arith.constant 0 : index
      %21 = vector.load %arg6[%c0_11, %c0_12] : memref<1x128xf32, #tpu.memory_space<vmem>>, vector<1x128xf32>
      %22 = vector.broadcast %21 : vector<1x128xf32> to vector<128x128xf32>
      %23 = arith.addf %20, %22 : vector<128x128xf32>
      %24 = arith.truncf %23 : vector<128x128xf32> to vector<128x128xbf16>
      %c0_13 = arith.constant 0 : index
      %c0_14 = arith.constant 0 : index
      %25 = vector.load %arg11[%c0_13, %c0_14] : memref<128x128xbf16, #tpu.memory_space<vmem>>, vector<128x128xbf16>
      tpu.vector_store %arg11[%c0_13, %c0_14], %24 {strides = array<i32>} : memref<128x128xbf16, #tpu.memory_space<vmem>>, vector<128x128xbf16>,
      %26 = arith.truncf %23 : vector<128x128xf32> to vector<128x128xbf16>
      %c0_15 = arith.constant 0 : index
      %c0_16 = arith.constant 0 : index
      %27 = vector.load %arg7[%c0_15, %c0_16] : memref<128x384xbf16, #tpu.memory_space<vmem>>, vector<128x384xbf16>
      %cst_17 = arith.constant dense<0.000000e+00> : vector<128x384xf32>
      %28 = tpu.matmul %26, %27, %cst_17 {dimension_numbers = #tpu.dot_dimension_numbers<[1], [0], [0], [1], [0, 0, 1, 1], [], []>} : vector<128x128xbf16>, vector<128x384xbf16>, vector<128x384xf32> -> vector<128x384xf32>
      %c0_18 = arith.constant 0 : index
      %c0_19 = arith.constant 0 : index
      %29 = vector.load %arg8[%c0_18, %c0_19] : memref<1x384xf32, #tpu.memory_space<vmem>>, vector<1x384xf32>
      %30 = vector.broadcast %29 : vector<1x384xf32> to vector<128x384xf32>
      %31 = arith.addf %28, %30 : vector<128x384xf32>
      %cst_20 = arith.constant 0.000000e+00 : f32
      %32 = vector.broadcast %cst_20 : f32 to vector<128x384xf32>
      %33 = arith.maximumf %31, %32 : vector<128x384xf32>
      %34 = arith.truncf %33 : vector<128x384xf32> to vector<128x384xbf16>
      %c0_21 = arith.constant 0 : index
      %c0_22 = arith.constant 0 : index
      %35 = vector.load %arg14[%c0_21, %c0_22] : memref<128x384xbf16, #tpu.memory_space<vmem>>, vector<128x384xbf16>
      tpu.vector_store %arg14[%c0_21, %c0_22], %34 {strides = array<i32>} : memref<128x384xbf16, #tpu.memory_space<vmem>>, vector<128x384xbf16>,
    } else {
    }
    %c3_i32_3 = arith.constant 3 : i32
    %9 = arith.cmpi sge, %arg1, %c3_i32_3 : i32
    %10 = arith.extui %9 : i1 to i32
    %c0_i32_4 = arith.constant 0 : i32
    %11 = arith.cmpi ne, %10, %c0_i32_4 : i32
    scf.if %11 {
      %c0 = arith.constant 0 : index
      %c0_5 = arith.constant 0 : index
      %12 = vector.load %arg14[%c0, %c0_5] : memref<128x384xbf16, #tpu.memory_space<vmem>>, vector<128x384xbf16>
      %c0_6 = arith.constant 0 : index
      %c0_7 = arith.constant 0 : index
      %13 = vector.load %arg9[%c0_6, %c0_7] : memref<384x128xbf16, #tpu.memory_space<vmem>>, vector<384x128xbf16>
      %cst = arith.constant dense<0.000000e+00> : vector<128x128xf32>
      %14 = tpu.matmul %12, %13, %cst {dimension_numbers = #tpu.dot_dimension_numbers<[1], [0], [0], [1], [0, 0, 1, 1], [], []>} : vector<128x384xbf16>, vector<384x128xbf16>, vector<128x128xf32> -> vector<128x128xf32>
      %c0_8 = arith.constant 0 : index
      %c0_9 = arith.constant 0 : index
      %15 = vector.load %arg10[%c0_8, %c0_9] : memref<1x128xf32, #tpu.memory_space<vmem>>, vector<1x128xf32>
      %16 = vector.broadcast %15 : vector<1x128xf32> to vector<128x128xf32>
      %17 = arith.addf %14, %16 : vector<128x128xf32>
      %18 = arith.truncf %17 : vector<128x128xf32> to vector<128x128xbf16>
      %c0_10 = arith.constant 0 : index
      %c0_11 = arith.constant 0 : index
      %19 = vector.load %arg12[%c0_10, %c0_11] : memref<128x128xbf16, #tpu.memory_space<vmem>>, vector<128x128xbf16>
      tpu.vector_store %arg12[%c0_10, %c0_11], %18 {strides = array<i32>} : memref<128x128xbf16, #tpu.memory_space<vmem>>, vector<128x128xbf16>,
    } else {
    }
    return
  }
  func.func @transform_0(%arg0: i32, %arg1: i32) -> (i32, i32) {
    %c2_i32 = arith.constant 2 : i32
    %0 = arith.minsi %arg1, %c2_i32 : i32
    %c0_i32 = arith.constant 0 : i32
    return %arg0, %0 : i32, i32
  }
  func.func @transform_1(%arg0: i32, %arg1: i32) -> (i32, i32) {
    %c2_i32 = arith.constant 2 : i32
    %0 = arith.minsi %arg1, %c2_i32 : i32
    %c0_i32 = arith.constant 0 : i32
    %c0_i32_0 = arith.constant 0 : i32
    return %0, %c0_i32 : i32, i32
  }
  func.func @transform_2(%arg0: i32, %arg1: i32) -> (i32, i32) {
    %c0_i32 = arith.constant 0 : i32
    %c0_i32_0 = arith.constant 0 : i32
    %c0_i32_1 = arith.constant 0 : i32
    return %c0_i32, %c0_i32_0 : i32, i32
  }
  func.func @transform_3(%arg0: i32, %arg1: i32) -> (i32, i32) {
    %c0_i32 = arith.constant 0 : i32
    %c0_i32_0 = arith.constant 0 : i32
    %c0_i32_1 = arith.constant 0 : i32
    return %c0_i32, %c0_i32_0 : i32, i32
  }
  func.func @transform_4(%arg0: i32, %arg1: i32) -> (i32, i32) {
    %c0_i32 = arith.constant 0 : i32
    %c0_i32_0 = arith.constant 0 : i32
    %c0_i32_1 = arith.constant 0 : i32
    return %c0_i32, %c0_i32_0 : i32, i32
  }
  func.func @transform_5(%arg0: i32, %arg1: i32) -> (i32, i32) {
    %c0_i32 = arith.constant 0 : i32
    %c0_i32_0 = arith.constant 0 : i32
    %c0_i32_1 = arith.constant 0 : i32
    return %c0_i32, %c0_i32_0 : i32, i32
  }
  func.func @transform_6(%arg0: i32, %arg1: i32) -> (i32, i32) {
    %c0_i32 = arith.constant 0 : i32
    %c0_i32_0 = arith.constant 0 : i32
    %c0_i32_1 = arith.constant 0 : i32
    return %c0_i32, %c0_i32_0 : i32, i32
  }
  func.func @transform_7(%arg0: i32, %arg1: i32) -> (i32, i32) {
    %c3_i32 = arith.constant 3 : i32
    %0 = arith.subi %arg1, %c3_i32 : i32
    %c0_i32 = arith.constant 0 : i32
    %1 = arith.maxsi %0, %c0_i32 : i32
    %c0_i32_0 = arith.constant 0 : i32
    %c0_i32_1 = arith.constant 0 : i32
    return %c0_i32_0, %1 : i32, i32
  }
  func.func @transform_8(%arg0: i32, %arg1: i32) -> (i32, i32) {
    %c3_i32 = arith.constant 3 : i32
    %0 = arith.subi %arg1, %c3_i32 : i32
    %c0_i32 = arith.constant 0 : i32
    %1 = arith.maxsi %0, %c0_i32 : i32
    %c0_i32_0 = arith.constant 0 : i32
    %c0_i32_1 = arith.constant 0 : i32
    return %c0_i32_0, %1 : i32, i32
  }
  func.func @transform_9(%arg0: i32, %arg1: i32) -> (i32, i32) {
    %c0_i32 = arith.constant 0 : i32
    %c0_i32_0 = arith.constant 0 : i32
    return %arg0, %c0_i32 : i32, i32
  }
  func.func @transform_10(%arg0: i32, %arg1: i32) -> (i32, i32) {
    %c3_i32 = arith.constant 3 : i32
    %0 = arith.subi %arg1, %c3_i32 : i32
    %c0_i32 = arith.constant 0 : i32
    %1 = arith.maxsi %0, %c0_i32 : i32
    %c0_i32_0 = arith.constant 0 : i32
    return %arg0, %1 : i32, i32
  }
}

</mosaic_0001>

<bundles_post_ra>
// kernel: netbio_forward.1
= control target key start
LH: loop header
LB: loop body
LE: loop exit
PB: predicated region body
PF: predicated region fallthrough
CT: control target
= control target key end

     0   :  { %s4966_s0 = inlined_call_operand.vmem [shape: bf16[128,384], index: 0, kind: input, shape index: {}]   ;;  %s4967_s1 = inlined_call_operand.hbm [shape: bf16[384,384], index: 1, kind: input, shape index: {}]   ;;  %s4968_s2 = inlined_call_operand.vmem [shape: f32[1,384], index: 2, kind: input, shape index: {}]   ;;  %s4969_s3 = inlined_call_operand.vmem [shape: bf16[384,128], index: 3, kind: input, shape index: {}]   ;;  %s4970_s4 = inlined_call_operand.vmem [shape: f32[1,128], index: 4, kind: input, shape index: {}]   ;;  %s4971_s5 = inlined_call_operand.hbm [shape: bf16[128,384], index: 5, kind: input, shape index: {}]   ;;  %s4972_s6 = inlined_call_operand.vmem [shape: f32[1,384], index: 6, kind: input, shape index: {}]   ;;  %s4973_s7 = inlined_call_operand.hbm [shape: bf16[384,384], index: 7, kind: input, shape index: {}]   ;;  %s4974_s8 = inlined_call_operand.vmem [shape: f32[1,384], index: 8, kind: input, shape index: {}]   ;;  %s4975_s9 = inlined_call_operand.vmem [shape: bf16[128,128], index: 9, kind: output, shape index: {0}]   ;;  %s4976_s10 = inlined_call_operand.vmem [shape: bf16[128,384], index: 10, kind: output, shape index: {1}]  }
   0x1   :  { %4984 = sst [smem:[#allocation21_spill]] %s4966_s0 }
   0x2   :  { %4985 = sst [smem:[#allocation22_spill]] %s4968_s2 }
   0x3   :  { %4986 = sst [smem:[#allocation23_spill]] %s4969_s3 }
   0x4   :  { %4987 = sst [smem:[#allocation24_spill]] %s4970_s4 }
   0x5   :  { %4988 = sst [smem:[#allocation25_spill]] %s4971_s5 }
   0x6   :  { %4989 = sst [smem:[#allocation26_spill]] %s4972_s6 }
   0x7   :  { %4990 = sst [smem:[#allocation27_spill]] %s4974_s8 }
   0x8   :  { %4991 = sst [smem:[#allocation28_spill]] %s4975_s9 }
   0x9   :  { %4992 = sst [smem:[#allocation29_spill]] %s4976_s10 }
   0xa   :  { %16 = vsyncpa [#allocation6], 0 }
   0xb   :  { %18 = vsyncpa [#allocation6 + $0x1], 0 }
   0xc   :  { %19 = vsyncpa [#allocation8], 0  ;;  %s4254_s13 = smov 0   ;;  %s4256_s14 = smov 0  }
   0xd   :  { %s4258_s15 = smov 0   ;;  %s4260_s16 = smov 0  }
   0xe   :  { %s4262_s17 = smov 0   ;;  %s4264_s18 = smov 0  }
   0xf   :  { %s4266_s19 = smov 0   ;;  %s4268_s20 = smov 0  }
  0x10   :  { %s4270_s21 = smov 0  }
  0x11 LB: > { %4993 = sst [smem:[#allocation14_spill]] %s4177_s18  ;;  %s4298_s22 = sadd.s32 4294967295, %s4189_s21   ;;  %s4189_s21 = sphi %s4270_s21, %s25_s21   ;;  %s4185_s20 = sphi %s4268_s20, %s5022_s20   ;;  %s4181_s19 = sphi %s4266_s19, %s5021_s19   ;;  %s4177_s18 = sphi %s4264_s18, %s5020_s18   ;;  %s4173_s17 = sphi %s4262_s17, %s5027_s17   ;;  %s4169_s16 = sphi %s4260_s16, %s5026_s16   ;;  %s4165_s15 = sphi %s4258_s15, %s5025_s15   ;;  %s4161_s14 = sphi %s4256_s14, %s5024_s14   ;;  %s4157_s13 = sphi %s4254_s13, %s5023_s13  }
  0x12   : > { %4994 = sst [smem:[#allocation15_spill]] %s4185_s20  ;;  %s34_s23 = sadd.s32 1, %s4185_s20 }
  0x13   : > { %4995 = sst [smem:[#allocation16_spill]] %s4189_s21  ;;  %p35_p0 = scmp.ge.s32.totalorder %s34_s23, 6 }
  0x14   : > { %p41_p1 = scmp.lt.s32.totalorder %s4185_s20, 2  ;;  %s50_s24 = sadd.s32 1, %s4177_s18 }
  0x15   : > { %p57_p2 = scmp.ne.s32.totalorder %s4177_s18, %s4173_s17  ;;  %s5029_s23 = smov (%p35_p0, %s34_s23), 0 }
  0x16   : > { %4996 = sst [smem:[#allocation17_spill]] %s5029_s23  ;;  %p43_p3 = scmp.lt.s32.totalorder %s5029_s23, 2 }
  0x17   : > { %s4308_s25 = scalar_select %p41_p1, %s4185_s20, 2 }
  0x18   : > { %p58_p4 = scmp.eq.s32.totalorder %s4189_s21, 0  ;;  %p93_p5 = scmp.ne.s32.totalorder %s4173_s17, %s4169_s16 }
  0x19   : > { %p94_p6 = scmp.eq.s32.totalorder %s4298_s22, 0  ;;  %s3083_s30 = sadd.s32 4294967293, %s4185_s20 }
  0x1a   : > { %s44_s26 = scalar_select %p43_p3, %s5029_s23, 2 }
  0x1b   : > { %p4317_p7 = por %p58_p4, %p57_p2  ;;  %p4323_p8 = por %p94_p6, %p93_p5 }
  0x1c   : > { %s46_s29 = ssub.s32 %s4308_s25, %s44_s26  ;;  %p209_p10 = scmp.gt.s32.totalorder %s3083_s30, 0 }
  0x1d   : > { %p48_p9 = scmp.eq.s32.totalorder %s46_s29, 0  ;;  %s3084_s11 = sadd.s32 4294967293, %s5029_s23 }
  0x1e   : > { %s217_s12 = sadd.s32 1, %s4165_s15  ;;  %s5031_s30 = smov (!%p209_p10, %s3083_s30), 0 }
  0x1f   : > { %s4332_s16 = scalar_select %p48_p9, %s4177_s18, %s50_s24  }
  0x20   : > { %p212_p11 = scmp.gt.s32.totalorder %s3084_s11, 0  ;;  %p224_p12 = scmp.ne.s32.totalorder %s4165_s15, %s4161_s14 }
  0x21   : > { %4999 = sst [smem:[#allocation18_spill]] %s4332_s16  ;;  %p230_p13 = scmp.ne.s32.totalorder %s4161_s14, %s4157_s13 }
  0x22   : > { %p320_p0 = scmp.eq.s32.totalorder %s4298_s22, 5  ;;  %s5033_s11 = smov (!%p212_p11, %s3084_s11), 0 }
  0x23   : > { %p4343_p1 = por %p224_p12, %p58_p4  ;;  %p4349_p2 = por %p230_p13, %p94_p6 }
  0x24   : > { %s214_s24 = ssub.s32 %s5031_s30, %s5033_s11  ;;  %p4354_p3 = por %p320_p0, %p224_p12 }
  0x25   : > { %p215_p5 = scmp.eq.s32.totalorder %s214_s24, 0  ;;  %p3089_p9 = scmp.ge.s32.totalorder %s4189_s21, 1 }
  0x26   : > { %s5002_s23 = scalar_select %p4354_p3, 1, 0 }
  0x27   : > { %p333_p10 = scmp.lt.s32.totalorder %s4189_s21, 7  ;;  %s5006_s5 = sld [smem:[#allocation25_spill]] }
  0x28   : > { %5003 = sst [smem:[#allocation19_spill]] %s5002_s23  ;;  %s4191_s11 = smov [#allocation7]  }
  0x29   : > { %s4361_s13 = scalar_select %p215_p5, %s4165_s15, %s217_s12  }
  0x2a   : > { %p4363_p11 = pnand %p3089_p9, %p333_p10  ;;  %s355_s9 = sshll.u32 %s4191_s11, 4  ;;  %s356_s9 = int_to_ptr.vmem [resolvable:$true] %s355_s9 }
  0x2b   : > { %5004 = sst [smem:[#allocation20_spill]] %s4361_s13  ;;  %s4192_s24 = smov 192  }
  0x2c   : > { %p3933_p4 = pneg %p4363_p11  ;;  %s4193_s12 = smov 12  }
  0x2d   : > { %s353_s6 = sshll.u32 %s5006_s5, 4  ;;  %p3091_p13 = scmp.ge.s32.totalorder %s4189_s21, 6  ;;  %s354_s6 = int_to_ptr.hbm [resolvable:$true] %s353_s6 }
  0x2e   : > { %p3934_p12 = pnand %p3933_p4, %p94_p6 }
  0x2f   : > { %368 = sbr.rel (%p3091_p13) target bundleno = 90 (0x5a), region = 36 }
  0x30   : > { %3936 = dma.hbm_to_vmem [thread:$0]  (!%p3934_p12), %s354_s6, 3072, %s356_s9, [#allocation8], %s4192_s24, %s4192_s24, %s4193_s12  }
  0x34   : > { %371 = sbr.rel (!%p4317_p7) target bundleno = 78 (0x4e), region = 40  ;;  %s373_s10 = sand.u32 (%p4317_p7), 1, %s4177_s18  }
  0x35   : > { %s3093_s16 = sshll.u32 (%p4317_p7), %s4308_s25, 2  ;;  %s3092_s5 = sshll.u32 (%p4317_p7), %s373_s10, 6 }
  0x36   : > { %s5007_s0 = sld [smem:[#allocation21_spill]] (%p4317_p7)  ;;  %s375_s6 = scalar_lea.vmem (%p4317_p7), [#allocation4], %s3092_s5 }
  0x3c   : > { %s4382_s11 = scalar_lea.vmem %s5007_s0, %s3093_s16 }
  0x3d   : > { %v399_v0 = vld [vmem:[%s4382_s11] sm:$0xf]  ;;  %v401_v1 = vld [vmem:[%s4382_s11 + $0xc] sm:$0xf]  ;;  %v403_v2 = vld [vmem:[%s4382_s11 + $0x18] sm:$0xf] }
  0x3e   : > { %400 = vst [vmem:[%s375_s6] sm:$0xf] %v399_v0  ;;  %v405_v3 = vld [vmem:[%s4382_s11 + $0x24] sm:$0xf]  ;;  %v407_v4 = vld [vmem:[%s4382_s11 + $0x30] sm:$0xf] }
  0x3f   : > { %402 = vst [vmem:[%s375_s6 + $0x4] sm:$0xf] %v401_v1  ;;  %v409_v5 = vld [vmem:[%s4382_s11 + $0x3c] sm:$0xf]  ;;  %v411_v6 = vld [vmem:[%s4382_s11 + $0x48] sm:$0xf] }
  0x40   : > { %404 = vst [vmem:[%s375_s6 + $0x8] sm:$0xf] %v403_v2  ;;  %v413_v7 = vld [vmem:[%s4382_s11 + $0x54] sm:$0xf]  ;;  %v415_v8 = vld [vmem:[%s4382_s11 + $0x60] sm:$0xf] }
  0x41   : > { %406 = vst [vmem:[%s375_s6 + $0xc] sm:$0xf] %v405_v3  ;;  %v417_v9 = vld [vmem:[%s4382_s11 + $0x6c] sm:$0xf]  ;;  %v419_v10 = vld [vmem:[%s4382_s11 + $0x78] sm:$0xf] }
  0x42   : > { %408 = vst [vmem:[%s375_s6 + $0x10] sm:$0xf] %v407_v4  ;;  %v421_v11 = vld [vmem:[%s4382_s11 + $0x84] sm:$0xf]  ;;  %v423_v12 = vld [vmem:[%s4382_s11 + $0x90] sm:$0xf] }
  0x43   : > { %410 = vst [vmem:[%s375_s6 + $0x14] sm:$0xf] %v409_v5  ;;  %v425_v13 = vld [vmem:[%s4382_s11 + $0x9c] sm:$0xf]  ;;  %v427_v14 = vld [vmem:[%s4382_s11 + $0xa8] sm:$0xf] }
  0x44   : > { %412 = vst [vmem:[%s375_s6 + $0x18] sm:$0xf] %v411_v6  ;;  %v429_v15 = vld [vmem:[%s4382_s11 + $0xb4] sm:$0xf] }
  0x45   : > { %414 = vst [vmem:[%s375_s6 + $0x1c] sm:$0xf] %v413_v7 }
  0x46   : > { %416 = vst [vmem:[%s375_s6 + $0x20] sm:$0xf] %v415_v8 }
  0x47   : > { %418 = vst [vmem:[%s375_s6 + $0x24] sm:$0xf] %v417_v9 }
  0x48   : > { %420 = vst [vmem:[%s375_s6 + $0x28] sm:$0xf] %v419_v10 }
  0x49   : > { %422 = vst [vmem:[%s375_s6 + $0x2c] sm:$0xf] %v421_v11 }
  0x4a   : > { %424 = vst [vmem:[%s375_s6 + $0x30] sm:$0xf] %v423_v12 }
  0x4b   : > { %426 = vst [vmem:[%s375_s6 + $0x34] sm:$0xf] %v425_v13 }
  0x4c   : > { %428 = vst [vmem:[%s375_s6 + $0x38] sm:$0xf] %v427_v14 }
  0x4d   : > { %430 = vst [vmem:[%s375_s6 + $0x3c] sm:$0xf] %v429_v15 }
  0x4e PF: > { %s487_s5 = sand.u32 1, %s4189_s21   ;;  %s489_s9 = sand.u32 1, %s4177_s18  }
  0x4f   : > { %s3920_s23 = smul.u32 192, %s489_s9  ;;  %s514_s6 = sand.u32 1, %s4165_s15  }
  0x50   : > { %s3921_s13 = smul.u32 192, %s4308_s25  ;;  %s488_s4 = scalar_lea.sflag [#allocation6], %s487_s5 }
  0x51   : > { %s491_s16 = scalar_lea.vmem [#allocation5], %s3920_s23  ;;  %s4194_s2 = smov 192  }
  0x52   : > { %s499_s10 = scalar_lea.hbm %s4967_s1, %s3921_s13  ;;  %s502_s11 = sshll.u32 %s491_s16, 4  ;;  %s503_s11 = int_to_ptr.vmem [resolvable:$true] %s502_s11 }
  0x53   : > { %s500_s0 = sshll.u32 %s499_s10, 4  ;;  %s4195_s3 = smov 12   ;;  %s501_s0 = int_to_ptr.hbm [resolvable:$true] %s500_s0 }
  0x54   : > { %3927 = dma.hbm_to_vmem [thread:$0]  (%p4317_p7), %s501_s0, 3072, %s503_s11, %s488_s4, %s4194_s2, %s4194_s2, %s4195_s3  }
  0x55   : > { %s3922_s21 = smul.u32 192, %s514_s6  ;;  %s3098_s18 = sshll.u32 %s5031_s30, 2 }
  0x56   : > { %s523_s8 = scalar_lea.hbm %s4973_s7, %s3098_s18  ;;  %s4196_s12 = smov 64  }
  0x57   : > { %s524_s24 = sshll.u32 %s523_s8, 4  ;;  %s516_s23 = scalar_lea.vmem [#allocation9], %s3922_s21  ;;  %s525_s24 = int_to_ptr.hbm [resolvable:$true] %s524_s24 }
  0x58   : > { %s526_s13 = sshll.u32 %s516_s23, 4  ;;  %s4197_s10 = smov 4   ;;  %s527_s13 = int_to_ptr.vmem [resolvable:$true] %s526_s13 }
  0x59   : > { %3928 = dma.hbm_to_vmem [thread:$0]  (%p4343_p1), %s525_s24, 3072, %s527_s13, %s488_s4, %s4194_s2, %s4196_s12, %s4197_s10  }
  0x5a PF: > { %550 = sbr.rel (%p4363_p11) target bundleno = 1228 (0x4cc), region = 93  ;;  %s553_s0 = sand.u32 (!%p4363_p11), 1, %s4173_s17  }
  0x5b   : > { %s559_s3 = sand.u32 (!%p4363_p11), 1, %s4298_s22   ;;  %s3100_s27 = sshll.u32 (!%p4363_p11), %s553_s0, 6 }
  0x5c   : > { %s3923_s18 = smul.u32 (!%p4363_p11), 192, %s553_s0  ;;  %s4419_s8 = scalar_lea.vmem (!%p4363_p11), [#allocation4], %s3100_s27 }
  0x5d   : > { %s560_s21 = scalar_lea.sflag (!%p4363_p11), [#allocation6], %s559_s3 }
  0x5e   : > { %s4421_s30 = scalar_lea.vmem (!%p4363_p11), [#allocation5], %s3923_s18 }
  0x5f   : > { %4144 = dma.done.wait (%p4323_p8), %s560_s21, 3072  }
  0x60   : > { %4146 = vsyncadd (%p4323_p8), %s560_s21, 4294964224 }
  0x61   : > { %4148 = dma.done.wait (%p94_p6), [#allocation8], 3072  }
  0x62   : > { %4150 = vsyncadd (%p94_p6), [#allocation8], 4294964224  ;;  %s576_s2 = sand.u32 1, %s4161_s14  }
  0x63   : > { %s3924_s4 = smul.u32 192, %s576_s2 }
  0x65   : > { %s4432_s20 = scalar_lea.vmem [#allocation9], %s3924_s4 }
  0x66   : > { %4152 = dma.done.wait (%p4349_p2), %s560_s21, 3072  }
  0x67   : > { %4154 = vsyncadd (%p4349_p2), %s560_s21, 4294964224  ;;  %s3102_s28 = sshll.u32 %s576_s2, 6  ;;  %s3103_s26 = sadd.s32 4294967293, %s4181_s19 }
  0x68   : > { %p645_p7 = scmp.gt.s32.totalorder %s3103_s26, 0  ;;  %p3104_p8 = scmp.lt.s32.totalorder %s3103_s26, 2 }
  0x69   : > { %s5008_s11 = sld [smem:[#allocation27_spill]]  ;;  %s4448_s9 = scalar_lea.vmem [#allocation10], %s3102_s28 }
  0x6a   : > { %s5035_s26 = smov (!%p645_p7, %s3103_s26), 0  ;;  %p3109_p6 = scmp.ne.s32.totalorder %s4181_s19, 0 }
  0x6b   : > { %s4442_s22 = scalar_select %p3104_p8, %s5035_s26, 2 }
  0x6c   : > { %666 = sbr.rel (%p3109_p6) target bundleno = 162 (0xa2), region = 113 }
  0x6f   : > { %s649_s6 = scalar_lea.vmem %s5008_s11, %s4442_s22 }
  0x71   : > { %v4198_v16 = vmov 0.0  }
  0x72   : > { %667 = vst [vmem:[#allocation2 + $0xb0] sm:$0xff] %v4198_v16 }
  0x73   : > { %668 = vst [vmem:[#allocation2 + $0xd0] sm:$0xff] %v4198_v16 }
  0x74   : > { %669 = vst [vmem:[#allocation2 + $0x10] sm:$0xff] %v4198_v16 }
  0x75   : > { %670 = vst [vmem:[#allocation2 + $0x48] sm:$0xff] %v4198_v16 }
  0x76   : > { %671 = vst [vmem:[#allocation2 + $0x160] sm:$0xff] %v4198_v16 }
  0x77   : > { %672 = vst [vmem:[#allocation2 + $0x128] sm:$0xff] %v4198_v16 }
  0x78   : > { %673 = vst [vmem:[#allocation2 + $0x40] sm:$0xff] %v4198_v16 }
  0x79   : > { %674 = vst [vmem:[#allocation2 + $0x178] sm:$0xff] %v4198_v16 }
  0x7a   : > { %675 = vst [vmem:[#allocation2 + $0x108] sm:$0xff] %v4198_v16 }
  0x7b   : > { %676 = vst [vmem:[#allocation2 + $0x110] sm:$0xff] %v4198_v16 }
  0x7c   : > { %677 = vst [vmem:[#allocation2 + $0x90] sm:$0xff] %v4198_v16 }
  0x7d   : > { %678 = vst [vmem:[#allocation2 + $0x118] sm:$0xff] %v4198_v16 }
  0x7e   : > { %679 = vst [vmem:[#allocation2 + $0x148] sm:$0xff] %v4198_v16 }
  0x7f   : > { %680 = vst [vmem:[#allocation2 + $0x100] sm:$0xff] %v4198_v16 }
  0x80   : > { %681 = vst [vmem:[#allocation2 + $0x58] sm:$0xff] %v4198_v16 }
  0x81   : > { %682 = vst [vmem:[#allocation2 + $0xd8] sm:$0xff] %v4198_v16 }
  0x82   : > { %683 = vst [vmem:[#allocation2 + $0x80] sm:$0xff] %v4198_v16 }
  0x83   : > { %684 = vst [vmem:[#allocation2 + $0x130] sm:$0xff] %v4198_v16 }
  0x84   : > { %685 = vst [vmem:[#allocation2 + $0x138] sm:$0xff] %v4198_v16 }
  0x85   : > { %686 = vst [vmem:[#allocation2 + $0x120] sm:$0xff] %v4198_v16 }
  0x86   : > { %687 = vst [vmem:[#allocation2 + $0xe0] sm:$0xff] %v4198_v16 }
  0x87   : > { %688 = vst [vmem:[#allocation2 + $0xa8] sm:$0xff] %v4198_v16 }
  0x88   : > { %689 = vst [vmem:[#allocation2 + $0xb8] sm:$0xff] %v4198_v16 }
  0x89   : > { %690 = vst [vmem:[#allocation2 + $0x168] sm:$0xff] %v4198_v16 }
  0x8a   : > { %691 = vst [vmem:[#allocation2 + $0xe8] sm:$0xff] %v4198_v16 }
  0x8b   : > { %692 = vst [vmem:[#allocation2 + $0xf8] sm:$0xff] %v4198_v16 }
  0x8c   : > { %693 = vst [vmem:[#allocation2 + $0x20] sm:$0xff] %v4198_v16 }
  0x8d   : > { %694 = vst [vmem:[#allocation2 + $0x88] sm:$0xff] %v4198_v16 }
  0x8e   : > { %695 = vst [vmem:[#allocation2 + $0xa0] sm:$0xff] %v4198_v16 }
  0x8f   : > { %696 = vst [vmem:[#allocation2 + $0x170] sm:$0xff] %v4198_v16 }
  0x90   : > { %697 = vst [vmem:[#allocation2 + $0xf0] sm:$0xff] %v4198_v16 }
  0x91   : > { %698 = vst [vmem:[#allocation2 + $0x140] sm:$0xff] %v4198_v16 }
  0x92   : > { %699 = vst [vmem:[#allocation2 + $0x60] sm:$0xff] %v4198_v16 }
  0x93   : > { %700 = vst [vmem:[#allocation2 + $0xc8] sm:$0xff] %v4198_v16 }
  0x94   : > { %701 = vst [vmem:[#allocation2 + $0x28] sm:$0xff] %v4198_v16 }
  0x95   : > { %702 = vst [vmem:[#allocation2 + $0x38] sm:$0xff] %v4198_v16 }
  0x96   : > { %703 = vst [vmem:[#allocation2 + $0xc0] sm:$0xff] %v4198_v16 }
  0x97   : > { %704 = vst [vmem:[#allocation2 + $0x18] sm:$0xff] %v4198_v16 }
  0x98   : > { %705 = vst [vmem:[#allocation2 + $0x98] sm:$0xff] %v4198_v16 }
  0x99   : > { %706 = vst [vmem:[#allocation2 + $0x8] sm:$0xff] %v4198_v16 }
  0x9a   : > { %707 = vst [vmem:[#allocation2] sm:$0xff] %v4198_v16 }
  0x9b   : > { %708 = vst [vmem:[#allocation2 + $0x78] sm:$0xff] %v4198_v16 }
  0x9c   : > { %709 = vst [vmem:[#allocation2 + $0x50] sm:$0xff] %v4198_v16 }
  0x9d   : > { %710 = vst [vmem:[#allocation2 + $0x68] sm:$0xff] %v4198_v16 }
  0x9e   : > { %711 = vst [vmem:[#allocation2 + $0x70] sm:$0xff] %v4198_v16 }
  0x9f   : > { %712 = vst [vmem:[#allocation2 + $0x30] sm:$0xff] %v4198_v16 }
  0xa0   : > { %713 = vst [vmem:[#allocation2 + $0x158] sm:$0xff] %v4198_v16 }
  0xa1   : > { %714 = vst [vmem:[#allocation2 + $0x150] sm:$0xff] %v4198_v16 }
  0xa2 PF: > { %p3110_p0 = scmp.ge.s32.totalorder %s4181_s19, 3 }
  0xa4   : > { %718 = sbr.rel (%p3110_p0) target bundleno = 428 (0x1ac), region = 117 }
  0xa9   : > { %v3229_v17 = vld [vmem:[%s4421_s30 + $0xa8] sm:$0xf]  ;;  %v3664_v18 = vld [vmem:[%s4421_s30 + $0xb0] sm:$0xf0]  ;;  %v3663_v19 = vld [vmem:[%s4421_s30 + $0xac] sm:$0xf] }
  0xaa   : > { %v3230_v20 = vor.u32 %v3664_v18, %v3229_v17  ;;  %v3231_v21 = vld [vmem:[%s4421_s30 + $0xb4] sm:$0xf0]  ;;  %v3237_v22 = vld [vmem:[%s4421_s30 + $0xb0] sm:$0xf]  ;;  %v3665_v23 = vld [vmem:[%s4421_s30 + $0xb8] sm:$0xf0] }
  0xab   : > { %v4458_v24 = vor.u32 %v3663_v19, %v3231_v21  ;;  %v4460_v25 = vor.u32 %v3665_v23, %v3237_v22  ;;  %v3217_v26 = vld [vmem:[%s4421_s30 + $0x90] sm:$0xf]  ;;  %v3661_v27 = vld [vmem:[%s4421_s30 + $0x98] sm:$0xf0]  ;;  %v3660_v28 = vld [vmem:[%s4421_s30 + $0x94] sm:$0xf] }
  0xac   : > { %991 = vmatpush.bf16.msra.mxu0 %v3230_v20  ;;  %3856 = vmatpush.bf16.msra.mxu3 %v3230_v20  ;;  %v3218_v29 = vor.u32 %v3661_v27, %v3217_v26  ;;  %v3219_v30 = vld [vmem:[%s4421_s30 + $0x9c] sm:$0xf0]  ;;  %v3225_v31 = vld [vmem:[%s4421_s30 + $0x98] sm:$0xf]  ;;  %v3662_v32 = vld [vmem:[%s4421_s30 + $0xa0] sm:$0xf0] }
  0xad   : > { %1040 = vmatpush.bf16.msra.mxu1 %v4458_v24  ;;  %1089 = vmatpush.bf16.msra.mxu2 %v4460_v25  ;;  %v4470_v33 = vor.u32 %v3660_v28, %v3219_v30  ;;  %v4472_v34 = vor.u32 %v3662_v32, %v3225_v31  ;;  %v3205_v35 = vld [vmem:[%s4421_s30 + $0x78] sm:$0xf]  ;;  %v3658_v36 = vld [vmem:[%s4421_s30 + $0x80] sm:$0xf0]  ;;  %v3657_v37 = vld [vmem:[%s4421_s30 + $0x7c] sm:$0xf] }
  0xae   : > { %v3207_v38 = vld [vmem:[%s4421_s30 + $0x84] sm:$0xf0]  ;;  %v3213_v39 = vld [vmem:[%s4421_s30 + $0x80] sm:$0xf]  ;;  %v3659_v40 = vld [vmem:[%s4421_s30 + $0x88] sm:$0xf0]  ;;  %v3206_v41 = vor.u32 %v3658_v36, %v3205_v35 }
  0xaf   : > { %v4482_v42 = vor.u32 %v3657_v37, %v3207_v38  ;;  %v4484_v43 = vor.u32 %v3659_v40, %v3213_v39  ;;  %v3193_v44 = vld [vmem:[%s4421_s30 + $0x60] sm:$0xf]  ;;  %v3655_v45 = vld [vmem:[%s4421_s30 + $0x68] sm:$0xf0]  ;;  %v3654_v46 = vld [vmem:[%s4421_s30 + $0x64] sm:$0xf] }
  0xb0   : > { %992 = vmatpush.bf16.msra.mxu0 %v3218_v29  ;;  %3857 = vmatpush.bf16.msra.mxu3 %v3218_v29  ;;  %v3195_v47 = vld [vmem:[%s4421_s30 + $0x6c] sm:$0xf0]  ;;  %v3201_v48 = vld [vmem:[%s4421_s30 + $0x68] sm:$0xf]  ;;  %v3656_v49 = vld [vmem:[%s4421_s30 + $0x70] sm:$0xf0]  ;;  %v3194_v50 = vor.u32 %v3655_v45, %v3193_v44 }
  0xb1   : > { %1041 = vmatpush.bf16.msra.mxu1 %v4470_v33  ;;  %1090 = vmatpush.bf16.msra.mxu2 %v4472_v34  ;;  %v4494_v51 = vor.u32 %v3654_v46, %v3195_v47  ;;  %v4496_v52 = vor.u32 %v3656_v49, %v3201_v48  ;;  %v3181_v53 = vld [vmem:[%s4421_s30 + $0x48] sm:$0xf]  ;;  %v3652_v54 = vld [vmem:[%s4421_s30 + $0x50] sm:$0xf0]  ;;  %v3651_v55 = vld [vmem:[%s4421_s30 + $0x4c] sm:$0xf] }
  0xb2   : > { %v3183_v56 = vld [vmem:[%s4421_s30 + $0x54] sm:$0xf0]  ;;  %v3189_v57 = vld [vmem:[%s4421_s30 + $0x50] sm:$0xf]  ;;  %v3653_v58 = vld [vmem:[%s4421_s30 + $0x58] sm:$0xf0]  ;;  %v3182_v59 = vor.u32 %v3652_v54, %v3181_v53 }
  0xb3   : > { %v3186_v60 = vor.u32 %v3651_v55, %v3183_v56  ;;  %v4506_v61 = vor.u32 %v3653_v58, %v3189_v57  ;;  %v3169_v62 = vld [vmem:[%s4421_s30 + $0x30] sm:$0xf]  ;;  %v3649_v63 = vld [vmem:[%s4421_s30 + $0x38] sm:$0xf0]  ;;  %v3648_v0 = vld [vmem:[%s4421_s30 + $0x34] sm:$0xf] }
  0xb4   : > { %993 = vmatpush.bf16.msra.mxu0 %v3206_v41  ;;  %3858 = vmatpush.bf16.msra.mxu3 %v3206_v41  ;;  %v3171_v1 = vld [vmem:[%s4421_s30 + $0x3c] sm:$0xf0]  ;;  %v3177_v2 = vld [vmem:[%s4421_s30 + $0x38] sm:$0xf]  ;;  %v3650_v3 = vld [vmem:[%s4421_s30 + $0x40] sm:$0xf0]  ;;  %v3170_v4 = vor.u32 %v3649_v63, %v3169_v62 }
  0xb5   : > { %1042 = vmatpush.bf16.msra.mxu1 %v4482_v42  ;;  %1091 = vmatpush.bf16.msra.mxu2 %v4484_v43  ;;  %v3174_v5 = vor.u32 %v3648_v0, %v3171_v1  ;;  %v4515_v6 = vor.u32 %v3650_v3, %v3177_v2  ;;  %v3157_v7 = vld [vmem:[%s4421_s30 + $0x18] sm:$0xf]  ;;  %v3646_v8 = vld [vmem:[%s4421_s30 + $0x20] sm:$0xf0]  ;;  %v3645_v9 = vld [vmem:[%s4421_s30 + $0x1c] sm:$0xf] }
  0xb6   : > { %v3159_v10 = vld [vmem:[%s4421_s30 + $0x24] sm:$0xf0]  ;;  %v3165_v11 = vld [vmem:[%s4421_s30 + $0x20] sm:$0xf]  ;;  %v3647_v12 = vld [vmem:[%s4421_s30 + $0x28] sm:$0xf0]  ;;  %v3158_v13 = vor.u32 %v3646_v8, %v3157_v7 }
  0xb7   : > { %v3162_v14 = vor.u32 %v3645_v9, %v3159_v10  ;;  %v3166_v15 = vor.u32 %v3647_v12, %v3165_v11  ;;  %v3145_v16 = vld [vmem:[%s4421_s30] sm:$0xf]  ;;  %v3643_v17 = vld [vmem:[%s4421_s30 + $0x8] sm:$0xf0]  ;;  %v3642_v18 = vld [vmem:[%s4421_s30 + $0x4] sm:$0xf] }
  0xb8   : > { %994 = vmatpush.bf16.msra.mxu0 %v3194_v50  ;;  %3859 = vmatpush.bf16.msra.mxu3 %v3194_v50  ;;  %v3147_v19 = vld [vmem:[%s4421_s30 + $0xc] sm:$0xf0]  ;;  %v3153_v20 = vld [vmem:[%s4421_s30 + $0x8] sm:$0xf]  ;;  %v3644_v21 = vld [vmem:[%s4421_s30 + $0x10] sm:$0xf0]  ;;  %v3146_v22 = vor.u32 %v3643_v17, %v3145_v16 }
  0xb9   : > { %1043 = vmatpush.bf16.msra.mxu1 %v4494_v51  ;;  %1092 = vmatpush.bf16.msra.mxu2 %v4496_v52  ;;  %v3150_v23 = vor.u32 %v3642_v18, %v3147_v19  ;;  %v3154_v26 = vor.u32 %v3644_v21, %v3153_v20  ;;  %v3634_v27 = vld [vmem:[%s4419_s8] sm:$0xff]  ;;  %v3640_v28 = vld [vmem:[%s4419_s8 + $0x30] sm:$0xff]  ;;  %v3635_v29 = vld [vmem:[%s4419_s8 + $0x8] sm:$0xff] }
  0xba   : > { %v3641_v30 = vld [vmem:[%s4419_s8 + $0x38] sm:$0xff]  ;;  %v3639_v32 = vld [vmem:[%s4419_s8 + $0x28] sm:$0xff]  ;;  %v755_v39 = vld [vmem:[#allocation2 + $0xc0] sm:$0xff] }
  0xbb   : > { %v3637_v31 = vld [vmem:[%s4419_s8 + $0x18] sm:$0xff]  ;;  %v721_v40 = vld [vmem:[#allocation2 + $0x10] sm:$0xff]  ;;  %v723_v45 = vld [vmem:[#allocation2 + $0x160] sm:$0xff] }
  0xbc   : > { %995 = vmatpush.bf16.msra.mxu0 %v3182_v59  ;;  %3860 = vmatpush.bf16.msra.mxu3 %v3182_v59  ;;  %v725_v54 = vld [vmem:[#allocation2 + $0x40] sm:$0xff]  ;;  %v726_v57 = vld [vmem:[#allocation2 + $0x178] sm:$0xff]  ;;  %v761_v63 = vld [vmem:[#allocation2 + $0x50] sm:$0xff] }
  0xbd   : > { %1044 = vmatpush.bf16.msra.mxu1 %v3186_v60  ;;  %1093 = vmatpush.bf16.msra.mxu2 %v4506_v61  ;;  %v727_v0 = vld [vmem:[#allocation2 + $0x108] sm:$0xff]  ;;  %v728_v2 = vld [vmem:[#allocation2 + $0x110] sm:$0xff]  ;;  %v730_v12 = vld [vmem:[#allocation2 + $0x118] sm:$0xff] }
  0xbe   : > { %v764_v11 = vld [vmem:[#allocation2 + $0x30] sm:$0xff]  ;;  %v732_v17 = vld [vmem:[#allocation2 + $0x100] sm:$0xff] }
  0xc0   : > { %996 = vmatpush.bf16.msra.mxu0 %v3170_v4  ;;  %3861 = vmatpush.bf16.msra.mxu3 %v3170_v4 }
  0xc1   : > { %1045 = vmatpush.bf16.msra.mxu1 %v3174_v5  ;;  %1094 = vmatpush.bf16.msra.mxu2 %v4515_v6 }
  0xc4   : > { %997 = vmatpush.bf16.msra.mxu0 %v3158_v13  ;;  %3862 = vmatpush.bf16.msra.mxu3 %v3158_v13 }
  0xc5   : > { %1046 = vmatpush.bf16.msra.mxu1 %v3162_v14  ;;  %1095 = vmatpush.bf16.msra.mxu2 %v3166_v15 }
  0xc8   : > { %998 = vmatpush.bf16.msra.mxu0 %v3146_v22  ;;  %3863 = vmatpush.bf16.msra.mxu3 %v3146_v22 }
  0xc9   : > { %1047 = vmatpush.bf16.msra.mxu1 %v3150_v23  ;;  %1096 = vmatpush.bf16.msra.mxu2 %v3154_v26 }
  0xcb   : > { %999 = vmatmul.bf16.vlgmr.msra.gmra.mxu0 %v3634_v27  ;;  %1029 = vmatmul.bf16.vlgmr.msra.gmra.mxu3 %v3640_v28 }
  0xcc   : > { %3864 = vmatpush.bf16.msrb.mxu3 %v4458_v24  ;;  %1048 = vmatmul.bf16.vlgmr.msra.gmra.mxu1 %v3634_v27  ;;  %v3636_v24 = vld [vmem:[%s4419_s8 + $0x10] sm:$0xff] }
  0xcd   : > { %1097 = vmatmul.bf16.vlgmr.msra.gmra.mxu2 %v3634_v27 }
  0xd0   : > { %3865 = vmatpush.bf16.msrb.mxu3 %v4470_v33  ;;  %v719_v33 = vld [vmem:[#allocation2 + $0xb0] sm:$0xff] }
  0xd4   : > { %3866 = vmatpush.bf16.msrb.mxu3 %v4482_v42  ;;  %v722_v42 = vld [vmem:[#allocation2 + $0x48] sm:$0xff] }
  0xd8   : > { %3867 = vmatpush.bf16.msrb.mxu3 %v4494_v51  ;;  %v758_v51 = vld [vmem:[#allocation2 + $0x8] sm:$0xff] }
  0xdb   : > { %1004 = vmatmul.bf16.gmra.mxu0 %v3635_v29  ;;  %1034 = vmatmul.bf16.gmra.mxu3 %v3641_v30 }
  0xdc   : > { %3868 = vmatpush.bf16.msrb.mxu3 %v3186_v60  ;;  %1053 = vmatmul.bf16.gmra.mxu1 %v3635_v29 }
  0xdd   : > { %1102 = vmatmul.bf16.gmra.mxu2 %v3635_v29 }
  0xe0   : > { %3869 = vmatpush.bf16.msrb.mxu3 %v3174_v5  ;;  %v729_v5 = vld [vmem:[#allocation2 + $0x90] sm:$0xff] }
  0xe4   : > { %3870 = vmatpush.bf16.msrb.mxu3 %v3162_v14  ;;  %v731_v14 = vld [vmem:[#allocation2 + $0x148] sm:$0xff] }
  0xe8   : > { %3871 = vmatpush.bf16.msrb.mxu3 %v3150_v23  ;;  %v756_v23 = vld [vmem:[#allocation2 + $0x18] sm:$0xff] }
  0xeb   : > { %1009 = vmatmul.bf16.gmra.mxu0 %v3636_v24  ;;  %1078 = vmatmul.bf16.vlgmr.msrb.gmra.mxu3 %v3640_v28 }
  0xec   : > { %3872 = vmatpush.bf16.msra.mxu3 %v4460_v25  ;;  %1058 = vmatmul.bf16.gmra.mxu1 %v3636_v24  ;;  %v3638_v25 = vld [vmem:[%s4419_s8 + $0x20] sm:$0xff] }
  0xed   : > { %1107 = vmatmul.bf16.gmra.mxu2 %v3636_v24  ;;  %v735_v24 = vld [vmem:[#allocation2 + $0x80] sm:$0xff] }
  0xf0   : > { %3873 = vmatpush.bf16.msra.mxu3 %v4472_v34  ;;  %v720_v34 = vld [vmem:[#allocation2 + $0xd0] sm:$0xff] }
  0xf4   : > { %3874 = vmatpush.bf16.msra.mxu3 %v4484_v43 }
  0xf8   : > { %3875 = vmatpush.bf16.msra.mxu3 %v4496_v52  ;;  %v724_v52 = vld [vmem:[#allocation2 + $0x128] sm:$0xff] }
  0xfb   : > { %1014 = vmatmul.bf16.gmra.mxu0 %v3637_v31  ;;  %1083 = vmatmul.bf16.gmra.mxu3 %v3641_v30 }
  0xfc   : > { %3876 = vmatpush.bf16.msra.mxu3 %v4506_v61  ;;  %1063 = vmatmul.bf16.gmra.mxu1 %v3637_v31 }
  0xfd   : > { %1112 = vmatmul.bf16.gmra.mxu2 %v3637_v31 }
 0x100   : > { %3877 = vmatpush.bf16.msra.mxu3 %v4515_v6 }
 0x104   : > { %3878 = vmatpush.bf16.msra.mxu3 %v3166_v15 }
 0x108   : > { %3879 = vmatpush.bf16.msra.mxu3 %v3154_v26  ;;  %v733_v26 = vld [vmem:[#allocation2 + $0x58] sm:$0xff] }
 0x10b   : > { %1019 = vmatmul.bf16.gmra.mxu0 %v3638_v25  ;;  %1127 = vmatmul.bf16.vlgmr.msra.gmra.mxu3 %v3640_v28  ;;  %v734_v28 = vld [vmem:[#allocation2 + $0xd8] sm:$0xff] }
 0x10c   : > { %1068 = vmatmul.bf16.gmra.mxu1 %v3638_v25 }
 0x10d   : > { %1117 = vmatmul.bf16.gmra.mxu2 %v3638_v25 }
 0x11b   : > { %1024 = vmatmul.bf16.gmra.mxu0 %v3639_v32  ;;  %1132 = vmatmul.bf16.gmra.mxu3 %v3641_v30 }
 0x11c   : > { %1073 = vmatmul.bf16.gmra.mxu1 %v3639_v32 }
 0x11d   : > { %1122 = vmatmul.bf16.gmra.mxu2 %v3639_v32 }
 0x148   : > { %v1000_v35 = vpop.f32.mrf.mxu0 }
 0x149   : > { %v1138_v36 = vadd.f32 %v1000_v35, %v719_v33  ;;  %v1049_v37 = vpop.f32.mrf.mxu1  ;;  %v759_v35 = vld [vmem:[#allocation2] sm:$0xff] }
 0x14a   : > { %v1139_v38 = vadd.f32 %v1049_v37, %v720_v34 }
 0x14b   : > { %1186 = vst [vmem:[#allocation2 + $0xb0] sm:$0xff] %v1138_v36  ;;  %v736_v36 = vld [vmem:[#allocation2 + $0x130] sm:$0xff] }
 0x14c   : > { %1187 = vst [vmem:[#allocation2 + $0xd0] sm:$0xff] %v1139_v38  ;;  %v737_v38 = vld [vmem:[#allocation2 + $0x138] sm:$0xff] }
 0x14e   : > { %v1030_v41 = vpop.f32.mrf.mxu3 }
 0x14f   : > { %v1174_v43 = vadd.f32 %v1030_v41, %v755_v39  ;;  %v738_v41 = vld [vmem:[#allocation2 + $0x120] sm:$0xff] }
 0x150   : > { %v1098_v44 = vpop.f32.mrf.mxu2  ;;  %v1002_v47 = vpop.f32.mrf.mxu0 }
 0x151   : > { %v1140_v46 = vadd.f32 %v1098_v44, %v721_v40  ;;  %1222 = vst [vmem:[#allocation2 + $0xc0] sm:$0xff] %v1174_v43  ;;  %v1141_v48 = vadd.f32 %v1002_v47, %v722_v42  ;;  %v1051_v49 = vpop.f32.mrf.mxu1  ;;  %v762_v47 = vld [vmem:[#allocation2 + $0x68] sm:$0xff] }
 0x152   : > { %v1142_v50 = vadd.f32 %v1051_v49, %v723_v45 }
 0x153   : > { %1188 = vst [vmem:[#allocation2 + $0x10] sm:$0xff] %v1140_v46 }
 0x154   : > { %1189 = vst [vmem:[#allocation2 + $0x48] sm:$0xff] %v1141_v48  ;;  %v739_v48 = vld [vmem:[#allocation2 + $0xe0] sm:$0xff] }
 0x155   : > { %1190 = vst [vmem:[#allocation2 + $0x160] sm:$0xff] %v1142_v50  ;;  %v740_v50 = vld [vmem:[#allocation2 + $0xa8] sm:$0xff] }
 0x156   : > { %v1032_v53 = vpop.f32.mrf.mxu3 }
 0x157   : > { %v1177_v55 = vadd.f32 %v1032_v53, %v758_v51  ;;  %v741_v53 = vld [vmem:[#allocation2 + $0xb8] sm:$0xff] }
 0x158   : > { %v1100_v56 = vpop.f32.mrf.mxu2  ;;  %v1005_v59 = vpop.f32.mrf.mxu0 }
 0x159   : > { %v1143_v58 = vadd.f32 %v1100_v56, %v724_v52  ;;  %1225 = vst [vmem:[#allocation2 + $0x8] sm:$0xff] %v1177_v55  ;;  %v1144_v60 = vadd.f32 %v1005_v59, %v725_v54  ;;  %v1054_v61 = vpop.f32.mrf.mxu1  ;;  %v765_v59 = vld [vmem:[#allocation2 + $0x158] sm:$0xff] }
 0x15a   : > { %v1145_v62 = vadd.f32 %v1054_v61, %v726_v57 }
 0x15b   : > { %1191 = vst [vmem:[#allocation2 + $0x128] sm:$0xff] %v1143_v58 }
 0x15c   : > { %1192 = vst [vmem:[#allocation2 + $0x40] sm:$0xff] %v1144_v60  ;;  %v742_v60 = vld [vmem:[#allocation2 + $0x168] sm:$0xff] }
 0x15d   : > { %1193 = vst [vmem:[#allocation2 + $0x178] sm:$0xff] %v1145_v62  ;;  %v743_v62 = vld [vmem:[#allocation2 + $0xe8] sm:$0xff] }
 0x15e   : > { %v1035_v1 = vpop.f32.mrf.mxu3 }
 0x15f   : > { %v1180_v3 = vadd.f32 %v1035_v1, %v761_v63  ;;  %v744_v1 = vld [vmem:[#allocation2 + $0xf8] sm:$0xff] }
 0x160   : > { %v1103_v4 = vpop.f32.mrf.mxu2  ;;  %v1007_v7 = vpop.f32.mrf.mxu0 }
 0x161   : > { %v1146_v6 = vadd.f32 %v1103_v4, %v727_v0  ;;  %1228 = vst [vmem:[#allocation2 + $0x50] sm:$0xff] %v1180_v3  ;;  %v1147_v8 = vadd.f32 %v1007_v7, %v728_v2  ;;  %v1056_v9 = vpop.f32.mrf.mxu1  ;;  %v757_v7 = vld [vmem:[#allocation2 + $0x98] sm:$0xff] }
 0x162   : > { %v1148_v10 = vadd.f32 %v1056_v9, %v729_v5 }
 0x163   : > { %1194 = vst [vmem:[#allocation2 + $0x108] sm:$0xff] %v1146_v6 }
 0x164   : > { %1195 = vst [vmem:[#allocation2 + $0x110] sm:$0xff] %v1147_v8  ;;  %v745_v8 = vld [vmem:[#allocation2 + $0x20] sm:$0xff] }
 0x165   : > { %1196 = vst [vmem:[#allocation2 + $0x90] sm:$0xff] %v1148_v10  ;;  %v746_v10 = vld [vmem:[#allocation2 + $0x88] sm:$0xff] }
 0x166   : > { %v1037_v13 = vpop.f32.mrf.mxu3 }
 0x167   : > { %v1183_v15 = vadd.f32 %v1037_v13, %v764_v11  ;;  %v747_v13 = vld [vmem:[#allocation2 + $0xa0] sm:$0xff] }
 0x168   : > { %v1105_v16 = vpop.f32.mrf.mxu2  ;;  %v1010_v19 = vpop.f32.mrf.mxu0 }
 0x169   : > { %v1149_v18 = vadd.f32 %v1105_v16, %v730_v12  ;;  %1231 = vst [vmem:[#allocation2 + $0x30] sm:$0xff] %v1183_v15  ;;  %v1150_v20 = vadd.f32 %v1010_v19, %v731_v14  ;;  %v1059_v21 = vpop.f32.mrf.mxu1  ;;  %v760_v19 = vld [vmem:[#allocation2 + $0x78] sm:$0xff] }
 0x16a   : > { %v1151_v22 = vadd.f32 %v1059_v21, %v732_v17 }
 0x16b   : > { %1197 = vst [vmem:[#allocation2 + $0x118] sm:$0xff] %v1149_v18 }
 0x16c   : > { %1198 = vst [vmem:[#allocation2 + $0x148] sm:$0xff] %v1150_v20  ;;  %v748_v20 = vld [vmem:[#allocation2 + $0x170] sm:$0xff] }
 0x16d   : > { %1199 = vst [vmem:[#allocation2 + $0x100] sm:$0xff] %v1151_v22  ;;  %v749_v22 = vld [vmem:[#allocation2 + $0xf0] sm:$0xff] }
 0x16e   : > { %v1079_v27 = vpop.f32.mrf.mxu3 }
 0x16f   : > { %v1175_v29 = vadd.f32 %v1079_v27, %v756_v23  ;;  %v750_v27 = vld [vmem:[#allocation2 + $0x140] sm:$0xff] }
 0x170   : > { %v1108_v30 = vpop.f32.mrf.mxu2  ;;  %v1012_v25 = vpop.f32.mrf.mxu0 }
 0x171   : > { %v1152_v31 = vadd.f32 %v1108_v30, %v733_v26  ;;  %1223 = vst [vmem:[#allocation2 + $0x18] sm:$0xff] %v1175_v29  ;;  %v1153_v32 = vadd.f32 %v1012_v25, %v734_v28  ;;  %v1061_v33 = vpop.f32.mrf.mxu1  ;;  %v763_v25 = vld [vmem:[#allocation2 + $0x70] sm:$0xff] }
 0x172   : > { %v1154_v34 = vadd.f32 %v1061_v33, %v735_v24 }
 0x173   : > { %1200 = vst [vmem:[#allocation2 + $0x58] sm:$0xff] %v1152_v31 }
 0x174   : > { %1201 = vst [vmem:[#allocation2 + $0xd8] sm:$0xff] %v1153_v32  ;;  %v751_v32 = vld [vmem:[#allocation2 + $0x60] sm:$0xff] }
 0x175   : > { %1202 = vst [vmem:[#allocation2 + $0x80] sm:$0xff] %v1154_v34  ;;  %v752_v34 = vld [vmem:[#allocation2 + $0xc8] sm:$0xff] }
 0x176   : > { %v1081_v37 = vpop.f32.mrf.mxu3 }
 0x177   : > { %v1178_v39 = vadd.f32 %v1081_v37, %v759_v35  ;;  %v753_v37 = vld [vmem:[#allocation2 + $0x28] sm:$0xff] }
 0x178   : > { %v1110_v40 = vpop.f32.mrf.mxu2  ;;  %v1015_v43 = vpop.f32.mrf.mxu0 }
 0x179   : > { %v1155_v42 = vadd.f32 %v1110_v40, %v736_v36  ;;  %1226 = vst [vmem:[#allocation2] sm:$0xff] %v1178_v39  ;;  %v1156_v44 = vadd.f32 %v1015_v43, %v737_v38  ;;  %v1064_v45 = vpop.f32.mrf.mxu1  ;;  %v766_v43 = vld [vmem:[#allocation2 + $0x150] sm:$0xff] }
 0x17a   : > { %v1157_v46 = vadd.f32 %v1064_v45, %v738_v41 }
 0x17b   : > { %1203 = vst [vmem:[#allocation2 + $0x130] sm:$0xff] %v1155_v42 }
 0x17c   : > { %1204 = vst [vmem:[#allocation2 + $0x138] sm:$0xff] %v1156_v44  ;;  %v754_v44 = vld [vmem:[#allocation2 + $0x38] sm:$0xff] }
 0x17d   : > { %1205 = vst [vmem:[#allocation2 + $0x120] sm:$0xff] %v1157_v46 }
 0x17e   : > { %v1084_v49 = vpop.f32.mrf.mxu3 }
 0x17f   : > { %v1181_v51 = vadd.f32 %v1084_v49, %v762_v47 }
 0x180   : > { %v1113_v52 = vpop.f32.mrf.mxu2  ;;  %v1017_v55 = vpop.f32.mrf.mxu0 }
 0x181   : > { %v1158_v54 = vadd.f32 %v1113_v52, %v739_v48  ;;  %1229 = vst [vmem:[#allocation2 + $0x68] sm:$0xff] %v1181_v51  ;;  %v1159_v56 = vadd.f32 %v1017_v55, %v740_v50  ;;  %v1066_v57 = vpop.f32.mrf.mxu1 }
 0x182   : > { %v1160_v58 = vadd.f32 %v1066_v57, %v741_v53 }
 0x183   : > { %1206 = vst [vmem:[#allocation2 + $0xe0] sm:$0xff] %v1158_v54 }
 0x184   : > { %1207 = vst [vmem:[#allocation2 + $0xa8] sm:$0xff] %v1159_v56 }
 0x185   : > { %1208 = vst [vmem:[#allocation2 + $0xb8] sm:$0xff] %v1160_v58 }
 0x186   : > { %v1086_v61 = vpop.f32.mrf.mxu3 }
 0x187   : > { %v1184_v63 = vadd.f32 %v1086_v61, %v765_v59 }
 0x188   : > { %v1115_v0 = vpop.f32.mrf.mxu2  ;;  %v1020_v3 = vpop.f32.mrf.mxu0 }
 0x189   : > { %v1161_v2 = vadd.f32 %v1115_v0, %v742_v60  ;;  %1232 = vst [vmem:[#allocation2 + $0x158] sm:$0xff] %v1184_v63  ;;  %v1162_v4 = vadd.f32 %v1020_v3, %v743_v62  ;;  %v1069_v5 = vpop.f32.mrf.mxu1 }
 0x18a   : > { %v1163_v6 = vadd.f32 %v1069_v5, %v744_v1 }
 0x18b   : > { %1209 = vst [vmem:[#allocation2 + $0x168] sm:$0xff] %v1161_v2 }
 0x18c   : > { %1210 = vst [vmem:[#allocation2 + $0xe8] sm:$0xff] %v1162_v4 }
 0x18d   : > { %1211 = vst [vmem:[#allocation2 + $0xf8] sm:$0xff] %v1163_v6 }
 0x18e   : > { %v1128_v9 = vpop.f32.mrf.mxu3 }
 0x18f   : > { %v1176_v12 = vadd.f32 %v1128_v9, %v757_v7 }
 0x190   : > { %v1118_v11 = vpop.f32.mrf.mxu2  ;;  %v1022_v15 = vpop.f32.mrf.mxu0 }
 0x191   : > { %v1164_v14 = vadd.f32 %v1118_v11, %v745_v8  ;;  %1224 = vst [vmem:[#allocation2 + $0x98] sm:$0xff] %v1176_v12  ;;  %v1165_v16 = vadd.f32 %v1022_v15, %v746_v10  ;;  %v1071_v17 = vpop.f32.mrf.mxu1 }
 0x192   : > { %v1166_v18 = vadd.f32 %v1071_v17, %v747_v13 }
 0x193   : > { %1212 = vst [vmem:[#allocation2 + $0x20] sm:$0xff] %v1164_v14 }
 0x194   : > { %1213 = vst [vmem:[#allocation2 + $0x88] sm:$0xff] %v1165_v16 }
 0x195   : > { %1214 = vst [vmem:[#allocation2 + $0xa0] sm:$0xff] %v1166_v18 }
 0x196   : > { %v1130_v21 = vpop.f32.mrf.mxu3 }
 0x197   : > { %v1179_v26 = vadd.f32 %v1130_v21, %v760_v19 }
 0x198   : > { %v1120_v23 = vpop.f32.mrf.mxu2  ;;  %v1025_v29 = vpop.f32.mrf.mxu0 }
 0x199   : > { %v1167_v28 = vadd.f32 %v1120_v23, %v748_v20  ;;  %1227 = vst [vmem:[#allocation2 + $0x78] sm:$0xff] %v1179_v26  ;;  %v1168_v30 = vadd.f32 %v1025_v29, %v749_v22  ;;  %v1074_v24 = vpop.f32.mrf.mxu1 }
 0x19a   : > { %v1169_v31 = vadd.f32 %v1074_v24, %v750_v27 }
 0x19b   : > { %1215 = vst [vmem:[#allocation2 + $0x170] sm:$0xff] %v1167_v28 }
 0x19c   : > { %1216 = vst [vmem:[#allocation2 + $0xf0] sm:$0xff] %v1168_v30 }
 0x19d   : > { %1217 = vst [vmem:[#allocation2 + $0x140] sm:$0xff] %v1169_v31 }
 0x19e   : > { %v1133_v33 = vpop.f32.mrf.mxu3 }
 0x19f   : > { %v1182_v36 = vadd.f32 %v1133_v33, %v763_v25 }
 0x1a0   : > { %v1123_v35 = vpop.f32.mrf.mxu2  ;;  %v1027_v39 = vpop.f32.mrf.mxu0 }
 0x1a1   : > { %v1170_v38 = vadd.f32 %v1123_v35, %v751_v32  ;;  %1230 = vst [vmem:[#allocation2 + $0x70] sm:$0xff] %v1182_v36  ;;  %v1171_v40 = vadd.f32 %v1027_v39, %v752_v34  ;;  %v1076_v41 = vpop.f32.mrf.mxu1 }
 0x1a2   : > { %v1172_v42 = vadd.f32 %v1076_v41, %v753_v37 }
 0x1a3   : > { %1218 = vst [vmem:[#allocation2 + $0x60] sm:$0xff] %v1170_v38 }
 0x1a4   : > { %1219 = vst [vmem:[#allocation2 + $0xc8] sm:$0xff] %v1171_v40 }
 0x1a5   : > { %1220 = vst [vmem:[#allocation2 + $0x28] sm:$0xff] %v1172_v42 }
 0x1a6   : > { %v1135_v45 = vpop.f32.mrf.mxu3 }
 0x1a7   : > { %v1185_v47 = vadd.f32 %v1135_v45, %v766_v43 }
 0x1a8   : > { %v1125_v46 = vpop.f32.mrf.mxu2 }
 0x1a9   : > { %v1173_v48 = vadd.f32 %v1125_v46, %v754_v44  ;;  %1233 = vst [vmem:[#allocation2 + $0x150] sm:$0xff] %v1185_v47 }
 0x1ab   : > { %1221 = vst [vmem:[#allocation2 + $0x38] sm:$0xff] %v1173_v48 }
 0x1ac PF: > { %p3239_p1 = scmp.ne.s32.totalorder %s4181_s19, 2 }
 0x1ad   : > { %s5009_s24 = sld [smem:[#allocation23_spill]] (!%p3239_p1) }
 0x1ae   : > { %1237 = sbr.rel (%p3239_p1) target bundleno = 938 (0x3aa), region = 121  ;;  %s5010_s13 = sld [smem:[#allocation22_spill]] (!%p3239_p1) }
 0x1af   : > { %s5011_s28 = sld [smem:[#allocation24_spill]] (!%p3239_p1) }
 0x1b0   : > { %s5012_s11 = sld [smem:[#allocation28_spill]] (!%p3239_p1) }
 0x1b1   : > { %s5013_s5 = sld [smem:[#allocation26_spill]] (!%p3239_p1) }
 0x1b3   : > { %v3673_v49 = vld [vmem:[%s5009_s24 + $0x38] sm:$0xff]  ;;  %v3672_v51 = vld [vmem:[%s5009_s24 + $0x30] sm:$0xff]  ;;  %v3671_v53 = vld [vmem:[%s5009_s24 + $0x28] sm:$0xff] }
 0x1b4   : > { %v3681_v50 = vld [vmem:[%s5009_s24 + $0x78] sm:$0xff]  ;;  %3880 = vmatpush.bf16.msra.mxu2 %v3673_v49  ;;  %v3680_v52 = vld [vmem:[%s5009_s24 + $0x70] sm:$0xff]  ;;  %1610 = vmatpush.bf16.msra.mxu0 %v3673_v49  ;;  %v3679_v54 = vld [vmem:[%s5009_s24 + $0x68] sm:$0xff] }
 0x1b5   : > { %3888 = vmatpush.bf16.msra.mxu3 %v3681_v50  ;;  %1659 = vmatpush.bf16.msra.mxu1 %v3681_v50  ;;  %v3670_v55 = vld [vmem:[%s5009_s24 + $0x20] sm:$0xff]  ;;  %v3669_v57 = vld [vmem:[%s5009_s24 + $0x18] sm:$0xff]  ;;  %v3668_v60 = vld [vmem:[%s5009_s24 + $0x10] sm:$0xff] }
 0x1b6   : > { %v3678_v56 = vld [vmem:[%s5009_s24 + $0x60] sm:$0xff]  ;;  %v3677_v58 = vld [vmem:[%s5009_s24 + $0x58] sm:$0xff]  ;;  %v3676_v61 = vld [vmem:[%s5009_s24 + $0x50] sm:$0xff] }
 0x1b7   : > { %v4582_v59 = vld [vmem:[%s5010_s13] sm:$0x7]  ;;  %v1262_v62 = vld [vmem:[#allocation2 + $0xe8] sm:$0xff]  ;;  %v1263_v2 = vld [vmem:[#allocation2 + $0xf8] sm:$0xff] }
 0x1b8   : > { %3881 = vmatpush.bf16.msra.mxu2 %v3672_v51  ;;  %1611 = vmatpush.bf16.msra.mxu0 %v3672_v51  ;;  %v4591_v63 = vperm.slane %v4582_v59, 0  ;;  %v4594_v0 = vperm.slane %v4582_v59, 1  ;;  %v1265_v1 = vld [vmem:[#allocation2 + $0x88] sm:$0xff]  ;;  %v1266_v3 = vld [vmem:[#allocation2 + $0xa0] sm:$0xff]  ;;  %v3689_v16 = vld [vmem:[%s5009_s24 + $0xb8] sm:$0xff] }
 0x1b9   : > { %3889 = vmatpush.bf16.msra.mxu3 %v3680_v52  ;;  %1660 = vmatpush.bf16.msra.mxu1 %v3680_v52  ;;  %v3667_v8 = vld [vmem:[%s5009_s24 + $0x8] sm:$0xff]  ;;  %v3666_v14 = vld [vmem:[%s5009_s24] sm:$0xff]  ;;  %v3688_v19 = vld [vmem:[%s5009_s24 + $0xb0] sm:$0xff] }
 0x1ba   : > { %v1318_v4 = vadd.f32 %v4591_v63, %v1262_v62  ;;  %v1321_v5 = vadd.f32 %v4591_v63, %v1265_v1  ;;  %v1319_v6 = vadd.f32 %v4594_v0, %v1263_v2  ;;  %v1322_v7 = vadd.f32 %v4594_v0, %v1266_v3  ;;  %v3675_v9 = vld [vmem:[%s5009_s24 + $0x48] sm:$0xff]  ;;  %v3674_v15 = vld [vmem:[%s5009_s24 + $0x40] sm:$0xff]  ;;  %v1268_v20 = vld [vmem:[#allocation2 + $0xf0] sm:$0xff] }
 0x1bb   : > { %v1271_v21 = vld [vmem:[#allocation2 + $0xc8] sm:$0xff]  ;;  %v1269_v22 = vld [vmem:[#allocation2 + $0x140] sm:$0xff]  ;;  %v1324_v27 = vadd.f32 %v4591_v63, %v1268_v20  ;;  %v3685_v34 = vld [vmem:[%s5009_s24 + $0x98] sm:$0xff] }
 0x1bc   : > { %3882 = vmatpush.bf16.msra.mxu2 %v3671_v53  ;;  %1612 = vmatpush.bf16.msra.mxu0 %v3671_v53  ;;  %v1366_v10 = vmax.f32 %v1318_v4, 0.0  ;;  %v1369_v11 = vmax.f32 %v1321_v5, 0.0  ;;  %v1367_v12 = vmax.f32 %v1319_v6, 0.0  ;;  %v1370_v13 = vmax.f32 %v1322_v7, 0.0  ;;  %v1272_v23 = vld [vmem:[#allocation2 + $0x28] sm:$0xff]  ;;  %v3686_v24 = vld [vmem:[%s5009_s24 + $0xa0] sm:$0xff] }
 0x1bd   : > { %3890 = vmatpush.bf16.msra.mxu3 %v3679_v54  ;;  %1661 = vmatpush.bf16.msra.mxu1 %v3679_v54  ;;  %v3687_v26 = vld [vmem:[%s5009_s24 + $0xa8] sm:$0xff]  ;;  %v1327_v28 = vadd.f32 %v4591_v63, %v1271_v21  ;;  %v1325_v29 = vadd.f32 %v4594_v0, %v1269_v22  ;;  %v1328_v30 = vadd.f32 %v4594_v0, %v1272_v23  ;;  %v1372_v31 = vmax.f32 %v1324_v27, 0.0  ;;  %v3684_v37 = vld [vmem:[%s5009_s24 + $0x90] sm:$0xff]  ;;  %v1274_v38 = vld [vmem:[#allocation2 + $0xc0] sm:$0xff] }
 0x1be   : > { %v1402_v17 = vpack.c.bf16 %v1369_v11, %v1366_v10  ;;  %v1403_v18 = vpack.c.bf16 %v1370_v13, %v1367_v12  ;;  %v1277_v39 = vld [vmem:[#allocation2 + $0x8] sm:$0xff]  ;;  %v1275_v40 = vld [vmem:[#allocation2 + $0x18] sm:$0xff]  ;;  %v1278_v41 = vld [vmem:[#allocation2] sm:$0xff]  ;;  %v1330_v51 = vadd.f32 %v4591_v63, %v1274_v38 }
 0x1bf   : > { %v1375_v25 = vmax.f32 %v1327_v28, 0.0  ;;  %v1373_v32 = vmax.f32 %v1325_v29, 0.0  ;;  %v1376_v33 = vmax.f32 %v1328_v30, 0.0  ;;  %v1238_v42 = vld [vmem:[#allocation2 + $0xb0] sm:$0xff]  ;;  %v1241_v43 = vld [vmem:[#allocation2 + $0x48] sm:$0xff]  ;;  %v1242_v46 = vld [vmem:[#allocation2 + $0x160] sm:$0xff]  ;;  %v1333_v52 = vadd.f32 %v4591_v63, %v1277_v39 }
 0x1c0   : > { %3883 = vmatpush.bf16.msra.mxu2 %v3670_v55  ;;  %1613 = vmatpush.bf16.msra.mxu0 %v3670_v55  ;;  %v1294_v44 = vadd.f32 %v4591_v63, %v1238_v42  ;;  %v1239_v45 = vld [vmem:[#allocation2 + $0xd0] sm:$0xff]  ;;  %v3683_v47 = vld [vmem:[%s5009_s24 + $0x88] sm:$0xff]  ;;  %v1297_v48 = vadd.f32 %v4591_v63, %v1241_v43  ;;  %v1298_v50 = vadd.f32 %v4594_v0, %v1242_v46  ;;  %v1378_v1 = vmax.f32 %v1330_v51, 0.0  ;;  %v1245_v11 = vld [vmem:[#allocation2 + $0x178] sm:$0xff] }
 0x1c1   : > { %3891 = vmatpush.bf16.msra.mxu3 %v3678_v56  ;;  %1662 = vmatpush.bf16.msra.mxu1 %v3678_v56  ;;  %v1405_v35 = vpack.c.bf16 %v1375_v25, %v1372_v31  ;;  %v1406_v36 = vpack.c.bf16 %v1376_v33, %v1373_v32  ;;  %v1295_v49 = vadd.f32 %v4594_v0, %v1239_v45  ;;  %v1381_v2 = vmax.f32 %v1333_v52, 0.0  ;;  %v1280_v7 = vld [vmem:[#allocation2 + $0x50] sm:$0xff]  ;;  %v1281_v12 = vld [vmem:[#allocation2 + $0x68] sm:$0xff]  ;;  %v1284_v13 = vld [vmem:[#allocation2 + $0x158] sm:$0xff] }
 0x1c2   : > { %v1331_v53 = vadd.f32 %v4594_v0, %v1275_v40  ;;  %v1342_v54 = vmax.f32 %v1294_v44, 0.0  ;;  %v1334_v55 = vadd.f32 %v4594_v0, %v1278_v41  ;;  %v1345_v56 = vmax.f32 %v1297_v48, 0.0  ;;  %v1247_v10 = vld [vmem:[#allocation2 + $0x110] sm:$0xff]  ;;  %v1251_v38 = vld [vmem:[#allocation2 + $0x100] sm:$0xff]  ;;  %v1243_v40 = vld [vmem:[#allocation2 + $0x128] sm:$0xff] }
 0x1c3   : > { %v1408_v5 = vpack.c.bf16 %v1381_v2, %v1378_v1  ;;  %v1340_v27 = vadd.f32 %v4594_v0, %v1284_v13  ;;  %v1240_v39 = vld [vmem:[#allocation2 + $0x10] sm:$0xff]  ;;  %v1254_v43 = vld [vmem:[#allocation2 + $0x80] sm:$0xff]  ;;  %v1307_v44 = vadd.f32 %v4594_v0, %v1251_v38  ;;  %v1260_v2 = vld [vmem:[#allocation2 + $0xb8] sm:$0xff] }
 0x1c4   : > { %3884 = vmatpush.bf16.msra.mxu2 %v3669_v57  ;;  %1614 = vmatpush.bf16.msra.mxu0 %v3669_v57  ;;  %v1343_v57 = vmax.f32 %v1295_v49, 0.0  ;;  %v1379_v3 = vmax.f32 %v1331_v53, 0.0  ;;  %v1382_v4 = vmax.f32 %v1334_v55, 0.0  ;;  %v1310_v45 = vadd.f32 %v4594_v0, %v1254_v43  ;;  %v3430_v38 = vld [vmem:[#allocation7 + $0xb0] sm:$0xf] }
 0x1c5   : > { %3892 = vmatpush.bf16.msra.mxu3 %v3677_v58  ;;  %1663 = vmatpush.bf16.msra.mxu1 %v3677_v58  ;;  %v1346_v58 = vmax.f32 %v1298_v50, 0.0  ;;  %v1388_v32 = vmax.f32 %v1340_v27, 0.0  ;;  %v1355_v48 = vmax.f32 %v1307_v44, 0.0 }
 0x1c6   : > { %v1409_v6 = vpack.c.bf16 %v1382_v4, %v1379_v3  ;;  %v1358_v50 = vmax.f32 %v1310_v45, 0.0  ;;  %v1316_v4 = vadd.f32 %v4594_v0, %v1260_v2  ;;  %v3410_v45 = vld [vmem:[#allocation7 + $0x90] sm:$0xf]  ;;  %v3406_v2 = vld [vmem:[#allocation7 + $0x80] sm:$0xf] }
 0x1c7   : > { %v1391_v62 = vpack.c.bf16 %v1346_v58, %v1343_v57  ;;  %v1259_v57 = vld [vmem:[#allocation2 + $0xa8] sm:$0xff]  ;;  %v1257_v58 = vld [vmem:[#allocation2 + $0x120] sm:$0xff] }
 0x1c8   : > { %3885 = vmatpush.bf16.msra.mxu2 %v3668_v60  ;;  %1615 = vmatpush.bf16.msra.mxu0 %v3668_v60  ;;  %v3682_v60 = vld [vmem:[%s5009_s24 + $0x80] sm:$0xff]  ;;  %v1397_v52 = vpack.c.bf16 %v1358_v50, %v1355_v48  ;;  %v1315_v1 = vadd.f32 %v4591_v63, %v1259_v57  ;;  %v1313_v3 = vadd.f32 %v4594_v0, %v1257_v58  ;;  %v3708_v48 = vld [vmem:[#allocation7 + $0x94] sm:$0xf]  ;;  %v3398_v58 = vld [vmem:[#allocation7 + $0x78] sm:$0xf] }
 0x1c9   : > { %3893 = vmatpush.bf16.msra.mxu3 %v3676_v61  ;;  %1664 = vmatpush.bf16.msra.mxu1 %v3676_v61  ;;  %v1390_v61 = vpack.c.bf16 %v1345_v56, %v1342_v54  ;;  %v1256_v56 = vld [vmem:[#allocation2 + $0x138] sm:$0xff]  ;;  %v1270_v50 = vld [vmem:[#allocation2 + $0x60] sm:$0xff] }
 0x1cc   : > { %3886 = vmatpush.bf16.msra.mxu2 %v3667_v8  ;;  %1616 = vmatpush.bf16.msra.mxu0 %v3667_v8  ;;  %v1283_v8 = vld [vmem:[#allocation2 + $0x30] sm:$0xff] }
 0x1cd   : > { %3894 = vmatpush.bf16.msra.mxu3 %v3675_v9  ;;  %1665 = vmatpush.bf16.msra.mxu1 %v3675_v9  ;;  %v1244_v9 = vld [vmem:[#allocation2 + $0x40] sm:$0xff]  ;;  %v1339_v23 = vadd.f32 %v4591_v63, %v1283_v8 }
 0x1cf   : > { %v1387_v31 = vmax.f32 %v1339_v23, 0.0 }
 0x1d0   : > { %3887 = vmatpush.bf16.msra.mxu2 %v3666_v14  ;;  %1617 = vmatpush.bf16.msra.mxu0 %v3666_v14  ;;  %v1300_v14 = vadd.f32 %v4591_v63, %v1244_v9 }
 0x1d1   : > { %3895 = vmatpush.bf16.msra.mxu3 %v3674_v15  ;;  %1666 = vmatpush.bf16.msra.mxu1 %v3674_v15  ;;  %v1303_v15 = vadd.f32 %v4591_v63, %v1247_v10  ;;  %v1364_v10 = vmax.f32 %v1316_v4, 0.0  ;;  %v3707_v4 = vld [vmem:[#allocation7 + $0x88] sm:$0xf0] }
 0x1d2   : > { %v1348_v20 = vmax.f32 %v1300_v14, 0.0 }
 0x1d3   : > { %1638 = vmatmul.bf16.vlgmr.msra.gmra.mxu2 %v1402_v17  ;;  %1618 = vmatmul.bf16.vlgmr.msra.gmra.mxu0 %v1390_v61  ;;  %v1301_v17 = vadd.f32 %v4594_v0, %v1245_v11  ;;  %v1351_v21 = vmax.f32 %v1303_v15, 0.0  ;;  %v1249_v61 = vld [vmem:[#allocation2 + $0x118] sm:$0xff] }
 0x1d4   : > { %1708 = vmatpush.bf16.msrb.mxu2 %v3689_v16  ;;  %1687 = vmatmul.bf16.vlgmr.msra.gmra.mxu3 %v1403_v18  ;;  %v1248_v16 = vld [vmem:[#allocation2 + $0x90] sm:$0xff]  ;;  %v1252_v15 = vld [vmem:[#allocation2 + $0x58] sm:$0xff] }
 0x1d5   : > { %1667 = vmatmul.bf16.vlgmr.msra.gmra.mxu1 %v1391_v62  ;;  %v1304_v18 = vadd.f32 %v4594_v0, %v1248_v16  ;;  %v1349_v22 = vmax.f32 %v1301_v17, 0.0  ;;  %v1393_v29 = vpack.c.bf16 %v1351_v21, %v1348_v20  ;;  %v1312_v62 = vadd.f32 %v4591_v63, %v1256_v56  ;;  %v1255_v16 = vld [vmem:[#allocation2 + $0x130] sm:$0xff]  ;;  %v1258_v21 = vld [vmem:[#allocation2 + $0xe0] sm:$0xff] }
 0x1d7   : > { %v1352_v28 = vmax.f32 %v1304_v18, 0.0 }
 0x1d8   : > { %1709 = vmatpush.bf16.msrb.mxu2 %v3688_v19  ;;  %v1336_v19 = vadd.f32 %v4591_v63, %v1280_v7  ;;  %v1361_v7 = vmax.f32 %v1313_v3, 0.0 }
 0x1d9   : > { %v1394_v30 = vpack.c.bf16 %v1352_v28, %v1349_v22  ;;  %v1261_v22 = vld [vmem:[#allocation2 + $0x168] sm:$0xff] }
 0x1dc   : > { %1710 = vmatpush.bf16.msrb.mxu2 %v3687_v26  ;;  %v1337_v26 = vadd.f32 %v4594_v0, %v1281_v12  ;;  %v1400_v12 = vpack.c.bf16 %v1364_v10, %v1361_v7  ;;  %v3407_v7 = vor.u32 %v3707_v4, %v3406_v2  ;;  %v3386_v10 = vld [vmem:[#allocation7 + $0x60] sm:$0xf]  ;;  %v3690_v4 = vld [vmem:[#allocation7 + $0x4] sm:$0xf] }
 0x1de   : > { %v1385_v25 = vmax.f32 %v1337_v26, 0.0 }
 0x1e0   : > { %1711 = vmatpush.bf16.msrb.mxu2 %v3686_v24  ;;  %v1384_v24 = vmax.f32 %v1336_v19, 0.0 }
 0x1e2   : > { %v1411_v33 = vpack.c.bf16 %v1387_v31, %v1384_v24  ;;  %v1267_v24 = vld [vmem:[#allocation2 + $0x170] sm:$0xff] }
 0x1e3   : > { %1643 = vmatmul.bf16.gmra.mxu2 %v1405_v35  ;;  %1623 = vmatmul.bf16.gmra.mxu0 %v1393_v29  ;;  %v4657_v35 = vperm.slane %v4582_v59, 2 }
 0x1e4   : > { %1712 = vmatpush.bf16.msrb.mxu2 %v3685_v34  ;;  %1692 = vmatmul.bf16.gmra.mxu3 %v1406_v36  ;;  %v1412_v34 = vpack.c.bf16 %v1388_v32, %v1385_v25  ;;  %v1250_v36 = vld [vmem:[#allocation2 + $0x148] sm:$0xff] }
 0x1e5   : > { %1672 = vmatmul.bf16.gmra.mxu1 %v1394_v30  ;;  %v1306_v41 = vadd.f32 %v4591_v63, %v1250_v36  ;;  %v1296_v59 = vadd.f32 %v4657_v35, %v1240_v39  ;;  %v1299_v49 = vadd.f32 %v4657_v35, %v1243_v40  ;;  %v1305_v9 = vadd.f32 %v4657_v35, %v1249_v61  ;;  %v1264_v30 = vld [vmem:[#allocation2 + $0x20] sm:$0xff]  ;;  %v3422_v32 = vld [vmem:[#allocation7 + $0xa8] sm:$0xf]  ;;  %v3711_v36 = vld [vmem:[#allocation7 + $0xac] sm:$0xf] }
 0x1e6   : > { %v1308_v0 = vadd.f32 %v4657_v35, %v1252_v15  ;;  %v1311_v17 = vadd.f32 %v4657_v35, %v1255_v16  ;;  %v1314_v23 = vadd.f32 %v4657_v35, %v1258_v21  ;;  %v1317_v26 = vadd.f32 %v4657_v35, %v1261_v22  ;;  %v3713_v40 = vld [vmem:[#allocation7 + $0xb8] sm:$0xf0]  ;;  %v3374_v22 = vld [vmem:[#allocation7 + $0x48] sm:$0xf] }
 0x1e7   : > { %v1354_v46 = vmax.f32 %v1306_v41, 0.0  ;;  %v1344_v53 = vmax.f32 %v1296_v59, 0.0  ;;  %v1347_v54 = vmax.f32 %v1299_v49, 0.0  ;;  %v1353_v14 = vmax.f32 %v1305_v9, 0.0  ;;  %v3412_v59 = vld [vmem:[#allocation7 + $0x9c] sm:$0xf0] }
 0x1e8   : > { %1713 = vmatpush.bf16.msrb.mxu2 %v3684_v37  ;;  %v1253_v37 = vld [vmem:[#allocation2 + $0xd8] sm:$0xff]  ;;  %v1356_v18 = vmax.f32 %v1308_v0, 0.0  ;;  %v1359_v19 = vmax.f32 %v1311_v17, 0.0  ;;  %v1362_v27 = vmax.f32 %v1314_v23, 0.0  ;;  %v1365_v28 = vmax.f32 %v1317_v26, 0.0 }
 0x1e9   : > { %v1309_v42 = vadd.f32 %v4591_v63, %v1253_v37  ;;  %v1392_v55 = vpack.c.bf16 %v1347_v54, %v1344_v53  ;;  %v1320_v31 = vadd.f32 %v4657_v35, %v1264_v30  ;;  %v1323_v25 = vadd.f32 %v4657_v35, %v1267_v24  ;;  %v3424_v37 = vld [vmem:[#allocation7 + $0xb4] sm:$0xf0]  ;;  %v3710_v53 = vld [vmem:[#allocation7 + $0xa0] sm:$0xf0]  ;;  %v3704_v17 = vld [vmem:[#allocation7 + $0x70] sm:$0xf0] }
 0x1ea   : > { %v1398_v20 = vpack.c.bf16 %v1359_v19, %v1356_v18  ;;  %v1401_v29 = vpack.c.bf16 %v1365_v28, %v1362_v27  ;;  %v3427_v39 = vor.u32 %v3711_v36, %v3424_v37  ;;  %v3431_v43 = vor.u32 %v3713_v40, %v3430_v38  ;;  %v3418_v49 = vld [vmem:[#allocation7 + $0x98] sm:$0xf]  ;;  %v3700_v23 = vld [vmem:[#allocation7 + $0x50] sm:$0xf0]  ;;  %v3699_v27 = vld [vmem:[#allocation7 + $0x4c] sm:$0xf] }
 0x1eb   : > { %v1368_v41 = vmax.f32 %v1320_v31, 0.0  ;;  %v3419_v54 = vor.u32 %v3710_v53, %v3418_v49  ;;  %v1326_v56 = vadd.f32 %v4657_v35, %v1270_v50  ;;  %v1276_v15 = vld [vmem:[#allocation2 + $0x98] sm:$0xff]  ;;  %v3375_v26 = vor.u32 %v3700_v23, %v3374_v22  ;;  %v3362_v36 = vld [vmem:[#allocation7 + $0x30] sm:$0xf]  ;;  %v3364_v40 = vld [vmem:[#allocation7 + $0x3c] sm:$0xf0] }
 0x1ec   : > { %1714 = vmatpush.bf16.msrb.mxu2 %v3683_v47  ;;  %v1357_v47 = vmax.f32 %v1309_v42, 0.0  ;;  %v1371_v42 = vmax.f32 %v1323_v25, 0.0  ;;  %2054 = vmatpush.bf16.msrb.mxu0 %v3427_v39  ;;  %v1279_v16 = vld [vmem:[#allocation2 + $0x78] sm:$0xff]  ;;  %v3696_v39 = vld [vmem:[#allocation7 + $0x34] sm:$0xf] }
 0x1ed   : > { %2103 = vmatpush.bf16.msrb.mxu1 %v3431_v43  ;;  %v1335_v21 = vadd.f32 %v4657_v35, %v1279_v16  ;;  %v3376_v28 = vld [vmem:[#allocation7 + $0x54] sm:$0xf0]  ;;  %v3701_v24 = vld [vmem:[#allocation7 + $0x58] sm:$0xf0]  ;;  %v3698_v43 = vld [vmem:[#allocation7 + $0x40] sm:$0xf0] }
 0x1ee   : > { %v1396_v51 = vpack.c.bf16 %v1357_v47, %v1354_v46  ;;  %v1404_v44 = vpack.c.bf16 %v1371_v42, %v1368_v41  ;;  %v3709_v46 = vld [vmem:[#allocation7 + $0x98] sm:$0xf0]  ;;  %v3379_v30 = vor.u32 %v3699_v27, %v3376_v28  ;;  %v3370_v41 = vld [vmem:[#allocation7 + $0x38] sm:$0xf]  ;;  %v3367_v42 = vor.u32 %v3696_v39, %v3364_v40  ;;  %v4702_v16 = vld [vmem:[%s5011_s28] ss:$0 sm:$0xff] }
 0x1ef   : > { %v3411_v47 = vor.u32 %v3709_v46, %v3410_v45  ;;  %v1383_v25 = vmax.f32 %v1335_v21, 0.0  ;;  %v3697_v37 = vld [vmem:[#allocation7 + $0x38] sm:$0xf0]  ;;  %v1285_v45 = vld [vmem:[#allocation2 + $0x150] sm:$0xff]  ;;  %v3371_v46 = vor.u32 %v3698_v43, %v3370_v41 }
 0x1f0   : > { %1715 = vmatpush.bf16.msrb.mxu2 %v3682_v60  ;;  %v1246_v60 = vld [vmem:[#allocation2 + $0x108] sm:$0xff]  ;;  %v3363_v38 = vor.u32 %v3697_v37, %v3362_v36  ;;  %v3693_v53 = vld [vmem:[#allocation7 + $0x1c] sm:$0xf] }
 0x1f1   : > { %v1302_v8 = vadd.f32 %v4657_v35, %v1246_v60  ;;  %2104 = vmatpush.bf16.msrb.mxu1 %v3419_v54  ;;  %v3706_v60 = vld [vmem:[#allocation7 + $0x80] sm:$0xf0] }
 0x1f2   : > { %v3399_v61 = vor.u32 %v3706_v60, %v3398_v58  ;;  %v3695_v58 = vld [vmem:[#allocation7 + $0x28] sm:$0xf0] }
 0x1f3   : > { %1648 = vmatmul.bf16.gmra.mxu2 %v1408_v5  ;;  %1628 = vmatmul.bf16.gmra.mxu0 %v1396_v51  ;;  %v1360_v5 = vmax.f32 %v1312_v62, 0.0  ;;  %v1350_v13 = vmax.f32 %v1302_v8, 0.0  ;;  %v1273_v51 = vld [vmem:[#allocation2 + $0x38] sm:$0xff] }
 0x1f4   : > { %1697 = vmatmul.bf16.gmra.mxu3 %v1409_v6  ;;  %v1363_v6 = vmax.f32 %v1315_v1, 0.0  ;;  %v1329_v57 = vadd.f32 %v4657_v35, %v1273_v51  ;;  %v3705_v62 = vld [vmem:[#allocation7 + $0x7c] sm:$0xf]  ;;  %v3400_v1 = vld [vmem:[#allocation7 + $0x84] sm:$0xf0] }
 0x1f5   : > { %1677 = vmatmul.bf16.gmra.mxu1 %v1397_v52  ;;  %v1395_v63 = vpack.c.bf16 %v1353_v14, %v1350_v13  ;;  %v3415_v52 = vor.u32 %v3708_v48, %v3412_v59  ;;  %v3403_v3 = vor.u32 %v3705_v62, %v3400_v1  ;;  %v3702_v13 = vld [vmem:[#allocation7 + $0x64] sm:$0xf]  ;;  %v3388_v14 = vld [vmem:[#allocation7 + $0x6c] sm:$0xf0]  ;;  %v1341_v59 = vadd.f32 %v4657_v35, %v1285_v45  ;;  %v3350_v51 = vld [vmem:[#allocation7 + $0x18] sm:$0xf] }
 0x1f6   : > { %v1399_v11 = vpack.c.bf16 %v1363_v6, %v1360_v5  ;;  %v1374_v5 = vmax.f32 %v1326_v56, 0.0  ;;  %v1377_v6 = vmax.f32 %v1329_v57, 0.0  ;;  %2105 = vmatpush.bf16.msrb.mxu1 %v3407_v7  ;;  %v3391_v0 = vor.u32 %v3702_v13, %v3388_v14  ;;  %v3352_v56 = vld [vmem:[#allocation7 + $0x24] sm:$0xf0]  ;;  %v3358_v57 = vld [vmem:[#allocation7 + $0x20] sm:$0xf] }
 0x1f7   : > { %2055 = vmatpush.bf16.msrb.mxu0 %v3415_v52  ;;  %v1389_v50 = vmax.f32 %v1341_v59, 0.0  ;;  %v3694_v52 = vld [vmem:[#allocation7 + $0x20] sm:$0xf0]  ;;  %v3355_v60 = vor.u32 %v3693_v53, %v3352_v56  ;;  %v3346_v7 = vld [vmem:[#allocation7 + $0x8] sm:$0xf] }
 0x1f8   : > { %v1407_v9 = vpack.c.bf16 %v1377_v6, %v1374_v5  ;;  %v3351_v54 = vor.u32 %v3694_v52, %v3350_v51  ;;  %v3340_v6 = vld [vmem:[#allocation7 + $0xc] sm:$0xf0] }
 0x1fb   : > { %2056 = vmatpush.bf16.msrb.mxu0 %v3403_v3  ;;  %v3338_v3 = vld [vmem:[#allocation7] sm:$0xf] }
 0x1ff   : > { %2057 = vmatpush.bf16.msrb.mxu0 %v3391_v0 }
 0x203   : > { %1653 = vmatmul.bf16.gmra.mxu2 %v1411_v33  ;;  %1633 = vmatmul.bf16.gmra.mxu0 %v1399_v11  ;;  %v3712_v33 = vld [vmem:[#allocation7 + $0xb0] sm:$0xf0]  ;;  %v3703_v11 = vld [vmem:[#allocation7 + $0x68] sm:$0xf0] }
 0x204   : > { %1702 = vmatmul.bf16.gmra.mxu3 %v1412_v34  ;;  %v3423_v34 = vor.u32 %v3712_v33, %v3422_v32  ;;  %2058 = vmatpush.bf16.msrb.mxu0 %v3379_v30 }
 0x205   : > { %1682 = vmatmul.bf16.gmra.mxu1 %v1400_v12  ;;  %v3387_v12 = vor.u32 %v3703_v11, %v3386_v10  ;;  %v3343_v10 = vor.u32 %v3690_v4, %v3340_v6 }
 0x206   : > { %2005 = vmatpush.bf16.msrb.mxu3 %v3423_v34 }
 0x208   : > { %2059 = vmatpush.bf16.msrb.mxu0 %v3367_v42 }
 0x20a   : > { %2006 = vmatpush.bf16.msrb.mxu3 %v3411_v47 }
 0x20c   : > { %2060 = vmatpush.bf16.msrb.mxu0 %v3355_v60 }
 0x20e   : > { %2007 = vmatpush.bf16.msrb.mxu3 %v3399_v61  ;;  %v3359_v61 = vor.u32 %v3695_v58, %v3358_v57 }
 0x210   : > { %2061 = vmatpush.bf16.msrb.mxu0 %v3343_v10 }
 0x212   : > { %2008 = vmatpush.bf16.msrb.mxu3 %v3387_v12 }
 0x213   : > { %1716 = vmatmul.bf16.vlgmr.msrb.gmra.mxu2 %v1392_v55 }
 0x216   : > { %2009 = vmatpush.bf16.msrb.mxu3 %v3375_v26 }
 0x21a   : > { %2010 = vmatpush.bf16.msrb.mxu3 %v3363_v38 }
 0x21e   : > { %2011 = vmatpush.bf16.msrb.mxu3 %v3351_v54 }
 0x223   : > { %1721 = vmatmul.bf16.gmra.mxu2 %v1395_v63  ;;  %v3394_v63 = vld [vmem:[#allocation7 + $0x68] sm:$0xf] }
 0x224   : > { %v3395_v18 = vor.u32 %v3704_v17, %v3394_v63 }
 0x226   : > { %2106 = vmatpush.bf16.msrb.mxu1 %v3395_v18 }
 0x233   : > { %1726 = vmatmul.bf16.gmra.mxu2 %v1398_v20  ;;  %v1332_v20 = vadd.f32 %v4657_v35, %v1276_v15 }
 0x235   : > { %v1380_v31 = vmax.f32 %v1332_v20, 0.0 }
 0x237   : > { %v1410_v34 = vpack.c.bf16 %v1383_v25, %v1380_v31 }
 0x243   : > { %1731 = vmatmul.bf16.gmra.mxu2 %v1401_v29  ;;  %v3382_v29 = vld [vmem:[#allocation7 + $0x50] sm:$0xf] }
 0x244   : > { %v3383_v32 = vor.u32 %v3701_v24, %v3382_v29 }
 0x246   : > { %2107 = vmatpush.bf16.msrb.mxu1 %v3383_v32 }
 0x24a   : > { %2108 = vmatpush.bf16.msrb.mxu1 %v3371_v46 }
 0x24e   : > { %2109 = vmatpush.bf16.msrb.mxu1 %v3359_v61 }
 0x250   : > { %v1619_v2 = vpop.f32.mrf.mxu0 }
 0x251   : > { %v1620_v0 = vadd.f32 %v4702_v16, %v1619_v2 }
 0x252   : > { %v1668_v12 = vpop.f32.mrf.mxu1 }
 0x253   : > { %1736 = vmatmul.bf16.gmra.mxu2 %v1404_v44  ;;  %v1282_v44 = vld [vmem:[#allocation2 + $0x70] sm:$0xff]  ;;  %v1669_v20 = vadd.f32 %v1668_v12, %v1620_v0 }
 0x254   : > { %v1338_v48 = vadd.f32 %v4657_v35, %v1282_v44  ;;  %v3691_v35 = vld [vmem:[#allocation7 + $0x8] sm:$0xf0] }
 0x255   : > { %v3339_v5 = vor.u32 %v3691_v35, %v3338_v3 }
 0x256   : > { %v4677_v55 = vpop.f32.mrf.mxu2  ;;  %v1386_v49 = vmax.f32 %v1338_v48, 0.0 }
 0x257   : > { %2012 = vmatpush.bf16.msrb.mxu3 %v3339_v5  ;;  %v1688_v12 = vpop.f32.mrf.mxu3 }
 0x258   : > { %v1413_v1 = vpack.c.bf16 %v1389_v50, %v1386_v49  ;;  %v1621_v14 = vpop.f32.mrf.mxu0 }
 0x259   : > { %v1622_v22 = vadd.f32 %v4702_v16, %v1621_v14 }
 0x25a   : > { %v1670_v15 = vpop.f32.mrf.mxu1 }
 0x25b   : > { %v1671_v26 = vadd.f32 %v1670_v15, %v1622_v22 }
 0x25e   : > { %v4681_v8 = vpop.f32.mrf.mxu2 }
 0x260   : > { %v1624_v17 = vpop.f32.mrf.mxu0 }
 0x262   : > { %v1673_v21 = vpop.f32.mrf.mxu1 }
 0x263   : > { %1741 = vmatmul.bf16.gmra.mxu2 %v1407_v9  ;;  %v3692_v9 = vld [vmem:[#allocation7 + $0x10] sm:$0xf0] }
 0x264   : > { %v3347_v11 = vor.u32 %v3692_v9, %v3346_v7 }
 0x266   : > { %v4683_v19 = vpop.f32.mrf.mxu2  ;;  %2110 = vmatpush.bf16.msrb.mxu1 %v3347_v11 }
 0x268   : > { %v1626_v28 = vpop.f32.mrf.mxu0 }
 0x269   : > { %v1627_v41 = vadd.f32 %v4702_v16, %v1626_v28 }
 0x26a   : > { %v1675_v25 = vpop.f32.mrf.mxu1 }
 0x26b   : > { %v1676_v44 = vadd.f32 %v1675_v25, %v1627_v41  ;;  %v1640_v25 = vadd.f32 %v4702_v16, %v4677_v55 }
 0x26e   : > { %v4687_v33 = vpop.f32.mrf.mxu2 }
 0x270   : > { %v1629_v40 = vpop.f32.mrf.mxu0 }
 0x271   : > { %v1630_v52 = vadd.f32 %v4702_v16, %v1629_v40 }
 0x272   : > { %v1678_v43 = vpop.f32.mrf.mxu1 }
 0x273   : > { %1746 = vmatmul.bf16.gmra.mxu2 %v1410_v34  ;;  %v1625_v34 = vadd.f32 %v4702_v16, %v1624_v17  ;;  %v1679_v58 = vadd.f32 %v1678_v43, %v1630_v52 }
 0x275   : > { %v1674_v39 = vadd.f32 %v1673_v21, %v1625_v34 }
 0x276   : > { %v4689_v47 = vpop.f32.mrf.mxu2 }
 0x278   : > { %v1631_v50 = vpop.f32.mrf.mxu0 }
 0x279   : > { %v1632_v60 = vadd.f32 %v4702_v16, %v1631_v50 }
 0x27a   : > { %v1680_v56 = vpop.f32.mrf.mxu1 }
 0x27b   : > { %v1681_v2 = vadd.f32 %v1680_v56, %v1632_v60 }
 0x27e   : > { %v4693_v62 = vpop.f32.mrf.mxu2 }
 0x282   : > { %v1683_v5 = vpop.f32.mrf.mxu1 }
 0x283   : > { %1751 = vmatmul.bf16.gmra.mxu2 %v1413_v1  ;;  %v1634_v1 = vpop.f32.mrf.mxu0 }
 0x284   : > { %v1635_v10 = vadd.f32 %v4702_v16, %v1634_v1 }
 0x286   : > { %v4695_v13 = vpop.f32.mrf.mxu2  ;;  %v1684_v17 = vadd.f32 %v1683_v5, %v1635_v10  ;;  %v1652_v5 = vadd.f32 %v4702_v16, %v4693_v62 }
 0x28b   : > { %v1636_v15 = vpop.f32.mrf.mxu0 }
 0x28e   : > { %v4697_v63 = vpop.f32.mrf.mxu2 }
 0x296   : > { %v1717_v18 = vpop.f32.mrf.mxu2 }
 0x297   : > { %v1718_v23 = vadd.f32 %v1717_v18, %v1669_v20  ;;  %v1637_v18 = vadd.f32 %v4702_v16, %v1636_v15  ;;  %v1685_v20 = vpop.f32.mrf.mxu1 }
 0x299   : > { %v1757_v29 = vpack.c.bf16 %v1718_v23, %v1718_v23  ;;  %v1686_v22 = vadd.f32 %v1685_v20, %v1637_v18 }
 0x29b   : > { %v1845_v32 = vunpack.c.l.b16 %v1757_v29 }
 0x29e   : > { %v1719_v27 = vpop.f32.mrf.mxu2 }
 0x29f   : > { %v1720_v30 = vadd.f32 %v1719_v27, %v1671_v26 }
 0x2a1   : > { %v1758_v24 = vpack.c.bf16 %v1720_v30, %v1720_v30  ;;  %v3765_v31 = vpack.c.bf16 %v1720_v30, %v1718_v23  ;;  %v1690_v23 = vpop.f32.mrf.mxu3 }
 0x2a3   : > { %3766 = vst [vmem:[%s5012_s11] sm:$0xff] %v3765_v31   ;;  %v1846_v36 = vunpack.c.l.b16 %v1758_v24 }
 0x2a5   : > { %v1861_v37 = vpack.c.b16 %v1846_v36, %v1845_v32 }
 0x2a6   : > { %v1722_v38 = vpop.f32.mrf.mxu2 }
 0x2a7   : > { %2013 = vmatmul.bf16.vlgmr.msrb.gmra.mxu3 %v1861_v37  ;;  %2062 = vmatmul.bf16.vlgmr.msrb.gmra.mxu0 %v1861_v37  ;;  %v1723_v42 = vadd.f32 %v1722_v38, %v1674_v39  ;;  %v1642_v38 = vadd.f32 %v4702_v16, %v4681_v8 }
 0x2a8   : > { %2111 = vmatmul.bf16.vlgmr.msrb.gmra.mxu1 %v1861_v37  ;;  %v1689_v37 = vadd.f32 %v1688_v12, %v1640_v25 }
 0x2a9   : > { %v1759_v46 = vpack.c.bf16 %v1723_v42, %v1723_v42  ;;  %v1693_v36 = vpop.f32.mrf.mxu3  ;;  %v1691_v40 = vadd.f32 %v1690_v23, %v1642_v38 }
 0x2ab   : > { %v1847_v51 = vunpack.c.l.b16 %v1759_v46 }
 0x2ae   : > { %v1724_v45 = vpop.f32.mrf.mxu2 }
 0x2af   : > { %v1725_v48 = vadd.f32 %v1724_v45, %v1676_v44 }
 0x2b1   : > { %v1760_v59 = vpack.c.bf16 %v1725_v48, %v1725_v48  ;;  %v3770_v49 = vpack.c.bf16 %v1725_v48, %v1723_v42  ;;  %v1695_v46 = vpop.f32.mrf.mxu3 }
 0x2b3   : > { %3842 = vst [vmem:[%s5012_s11 + $0x8] sm:$0xff] %v3770_v49   ;;  %v1848_v53 = vunpack.c.l.b16 %v1760_v59  ;;  %v1645_v59 = vadd.f32 %v4702_v16, %v4683_v19 }
 0x2b5   : > { %v1862_v54 = vpack.c.b16 %v1848_v53, %v1847_v51  ;;  %v1694_v8 = vadd.f32 %v1693_v36, %v1645_v59  ;;  %v1647_v51 = vadd.f32 %v4702_v16, %v4687_v33 }
 0x2b6   : > { %v1727_v57 = vpop.f32.mrf.mxu2 }
 0x2b7   : > { %2018 = vmatmul.bf16.gmra.mxu3 %v1862_v54  ;;  %2067 = vmatmul.bf16.gmra.mxu0 %v1862_v54  ;;  %v1728_v61 = vadd.f32 %v1727_v57, %v1679_v58 }
 0x2b8   : > { %2116 = vmatmul.bf16.gmra.mxu1 %v1862_v54  ;;  %v1696_v54 = vadd.f32 %v1695_v46, %v1647_v51 }
 0x2b9   : > { %v1761_v35 = vpack.c.bf16 %v1728_v61, %v1728_v61  ;;  %v1698_v53 = vpop.f32.mrf.mxu3 }
 0x2bb   : > { %v1849_v9 = vunpack.c.l.b16 %v1761_v35 }
 0x2be   : > { %v1729_v3 = vpop.f32.mrf.mxu2 }
 0x2bf   : > { %v1730_v4 = vadd.f32 %v1729_v3, %v1681_v2  ;;  %v1650_v2 = vadd.f32 %v4702_v16, %v4689_v47 }
 0x2c1   : > { %v1762_v6 = vpack.c.bf16 %v1730_v4, %v1730_v4  ;;  %v3775_v7 = vpack.c.bf16 %v1730_v4, %v1728_v61  ;;  %v1700_v35 = vpop.f32.mrf.mxu3  ;;  %v1699_v4 = vadd.f32 %v1698_v53, %v1650_v2 }
 0x2c3   : > { %3843 = vst [vmem:[%s5012_s11 + $0x10] sm:$0xff] %v3775_v7   ;;  %v1850_v11 = vunpack.c.l.b16 %v1762_v6  ;;  %v1701_v7 = vadd.f32 %v1700_v35, %v1652_v5 }
 0x2c5   : > { %v1863_v14 = vpack.c.b16 %v1850_v11, %v1849_v9 }
 0x2c6   : > { %v1732_v0 = vpop.f32.mrf.mxu2 }
 0x2c7   : > { %2023 = vmatmul.bf16.gmra.mxu3 %v1863_v14  ;;  %2072 = vmatmul.bf16.gmra.mxu0 %v1863_v14  ;;  %v1733_v21 = vadd.f32 %v1732_v0, %v1684_v17  ;;  %v1655_v17 = vadd.f32 %v4702_v16, %v4695_v13 }
 0x2c8   : > { %2121 = vmatmul.bf16.gmra.mxu1 %v1863_v14 }
 0x2c9   : > { %v1763_v27 = vpack.c.bf16 %v1733_v21, %v1733_v21  ;;  %v1703_v12 = vpop.f32.mrf.mxu3 }
 0x2ca   : > { %v1704_v62 = vadd.f32 %v1703_v12, %v1655_v17 }
 0x2cb   : > { %v1851_v24 = vunpack.c.l.b16 %v1763_v27 }
 0x2ce   : > { %v1734_v26 = vpop.f32.mrf.mxu2 }
 0x2cf   : > { %v1735_v28 = vadd.f32 %v1734_v26, %v1686_v22 }
 0x2d1   : > { %v1764_v29 = vpack.c.bf16 %v1735_v28, %v1735_v28  ;;  %v3780_v30 = vpack.c.bf16 %v1735_v28, %v1733_v21  ;;  %v1657_v21 = vadd.f32 %v4702_v16, %v4697_v63  ;;  %v1705_v22 = vpop.f32.mrf.mxu3  ;;  %v1821_v63 = vld [vmem:[%s5013_s5] sm:$0x7] }
 0x2d2   : > { %v4755_v16 = vperm.slane %v1821_v63, 2  ;;  %v4760_v38 = vperm.slane %v1821_v63, 0 }
 0x2d3   : > { %3844 = vst [vmem:[%s5012_s11 + $0x18] sm:$0xff] %v3780_v30   ;;  %v1852_v31 = vunpack.c.l.b16 %v1764_v29  ;;  %v1706_v26 = vadd.f32 %v1705_v22, %v1657_v21 }
 0x2d5   : > { %v1864_v32 = vpack.c.b16 %v1852_v31, %v1851_v24 }
 0x2d6   : > { %v1737_v34 = vpop.f32.mrf.mxu2 }
 0x2d7   : > { %2028 = vmatmul.bf16.gmra.mxu3 %v1864_v32  ;;  %2077 = vmatmul.bf16.gmra.mxu0 %v1864_v32  ;;  %v1738_v39 = vadd.f32 %v1737_v34, %v1689_v37  ;;  %v4757_v34 = vperm.slane %v1821_v63, 1 }
 0x2d8   : > { %2126 = vmatmul.bf16.gmra.mxu1 %v1864_v32 }
 0x2d9   : > { %v1765_v42 = vpack.c.bf16 %v1738_v39, %v1738_v39 }
 0x2db   : > { %v1853_v48 = vunpack.c.l.b16 %v1765_v42 }
 0x2de   : > { %v1739_v41 = vpop.f32.mrf.mxu2 }
 0x2df   : > { %v1740_v43 = vadd.f32 %v1739_v41, %v1691_v40 }
 0x2e1   : > { %v1766_v44 = vpack.c.bf16 %v1740_v43, %v1740_v43  ;;  %v3785_v45 = vpack.c.bf16 %v1740_v43, %v1738_v39 }
 0x2e3   : > { %3845 = vst [vmem:[%s5012_s11 + $0x20] sm:$0xff] %v3785_v45   ;;  %v1854_v55 = vunpack.c.l.b16 %v1766_v44 }
 0x2e5   : > { %v1865_v49 = vpack.c.b16 %v1854_v55, %v1853_v48 }
 0x2e6   : > { %v1742_v50 = vpop.f32.mrf.mxu2 }
 0x2e7   : > { %2033 = vmatmul.bf16.gmra.mxu3 %v1865_v49  ;;  %2082 = vmatmul.bf16.gmra.mxu0 %v1865_v49  ;;  %v1743_v52 = vadd.f32 %v1742_v50, %v1694_v8 }
 0x2e8   : > { %2131 = vmatmul.bf16.gmra.mxu1 %v1865_v49 }
 0x2e9   : > { %v1767_v57 = vpack.c.bf16 %v1743_v52, %v1743_v52 }
 0x2eb   : > { %v1855_v1 = vunpack.c.l.b16 %v1767_v57 }
 0x2ee   : > { %v1744_v56 = vpop.f32.mrf.mxu2 }
 0x2ef   : > { %v1745_v58 = vadd.f32 %v1744_v56, %v1696_v54 }
 0x2f1   : > { %v1768_v60 = vpack.c.bf16 %v1745_v58, %v1745_v58  ;;  %v3790_v61 = vpack.c.bf16 %v1745_v58, %v1743_v52 }
 0x2f3   : > { %3846 = vst [vmem:[%s5012_s11 + $0x28] sm:$0xff] %v3790_v61   ;;  %v1856_v19 = vunpack.c.l.b16 %v1768_v60 }
 0x2f5   : > { %v1866_v3 = vpack.c.b16 %v1856_v19, %v1855_v1 }
 0x2f6   : > { %v1747_v33 = vpop.f32.mrf.mxu2 }
 0x2f7   : > { %2038 = vmatmul.bf16.gmra.mxu3 %v1866_v3  ;;  %2087 = vmatmul.bf16.gmra.mxu0 %v1866_v3  ;;  %v1748_v6 = vadd.f32 %v1747_v33, %v1699_v4 }
 0x2f8   : > { %2136 = vmatmul.bf16.gmra.mxu1 %v1866_v3 }
 0x2f9   : > { %v1769_v10 = vpack.c.bf16 %v1748_v6, %v1748_v6 }
 0x2fb   : > { %v1857_v0 = vunpack.c.l.b16 %v1769_v10 }
 0x2fe   : > { %v1749_v9 = vpop.f32.mrf.mxu2 }
 0x2ff   : > { %v1750_v11 = vadd.f32 %v1749_v9, %v1701_v7 }
 0x301   : > { %v1770_v14 = vpack.c.bf16 %v1750_v11, %v1750_v11  ;;  %v3795_v15 = vpack.c.bf16 %v1750_v11, %v1748_v6 }
 0x303   : > { %3847 = vst [vmem:[%s5012_s11 + $0x30] sm:$0xff] %v3795_v15   ;;  %v1858_v47 = vunpack.c.l.b16 %v1770_v14 }
 0x305   : > { %v1867_v18 = vpack.c.b16 %v1858_v47, %v1857_v0 }
 0x306   : > { %v1752_v20 = vpop.f32.mrf.mxu2 }
 0x307   : > { %2043 = vmatmul.bf16.gmra.mxu3 %v1867_v18  ;;  %2092 = vmatmul.bf16.gmra.mxu0 %v1867_v18  ;;  %v1753_v23 = vadd.f32 %v1752_v20, %v1704_v62 }
 0x308   : > { %2141 = vmatmul.bf16.gmra.mxu1 %v1867_v18 }
 0x309   : > { %v1771_v28 = vpack.c.bf16 %v1753_v23, %v1753_v23 }
 0x30b   : > { %v1859_v31 = vunpack.c.l.b16 %v1771_v28 }
 0x30e   : > { %v1754_v27 = vpop.f32.mrf.mxu2 }
 0x30f   : > { %v1755_v29 = vadd.f32 %v1754_v27, %v1706_v26 }
 0x311   : > { %v1772_v30 = vpack.c.bf16 %v1755_v29, %v1755_v29  ;;  %v3800_v24 = vpack.c.bf16 %v1755_v29, %v1753_v23 }
 0x313   : > { %3848 = vst [vmem:[%s5012_s11 + $0x38] sm:$0xff] %v3800_v24   ;;  %v1860_v13 = vunpack.c.l.b16 %v1772_v30 }
 0x315   : > { %v1868_v25 = vpack.c.b16 %v1860_v13, %v1859_v31 }
 0x317   : > { %2048 = vmatmul.bf16.gmra.mxu3 %v1868_v25  ;;  %2097 = vmatmul.bf16.gmra.mxu0 %v1868_v25 }
 0x318   : > { %2146 = vmatmul.bf16.gmra.mxu1 %v1868_v25 }
 0x324   : > { %v2063_v32 = vpop.f32.mrf.mxu0 }
 0x325   : > { %v2112_v36 = vpop.f32.mrf.mxu1  ;;  %v2064_v40 = vadd.f32 %v2063_v32, %v4757_v34 }
 0x326   : > { %v2113_v37 = vadd.f32 %v2112_v36, %v4755_v16 }
 0x327   : > { %v2153_v45 = vmax.f32 %v2064_v40, 0.0 }
 0x328   : > { %v2154_v39 = vmax.f32 %v2113_v37, 0.0 }
 0x32a   : > { %v2201_v41 = vpack.c.bf16 %v2154_v39, %v2154_v39  ;;  %v2014_v42 = vpop.f32.mrf.mxu3 }
 0x32b   : > { %v2015_v43 = vadd.f32 %v2014_v42, %v4760_v38 }
 0x32c   : > { %2233 = vst [vmem:[#allocation3 + $0x8] sm:$0xf] %v2201_v41  ;;  %v2065_v44 = vpop.f32.mrf.mxu0 }
 0x32d   : > { %v2152_v46 = vmax.f32 %v2015_v43, 0.0  ;;  %v2114_v48 = vpop.f32.mrf.mxu1  ;;  %v2066_v50 = vadd.f32 %v2065_v44, %v4757_v34 }
 0x32e   : > { %v2115_v55 = vadd.f32 %v2114_v48, %v4755_v16 }
 0x32f   : > { %v2200_v59 = vpack.c.bf16 %v2153_v45, %v2152_v46  ;;  %v2156_v54 = vmax.f32 %v2066_v50, 0.0 }
 0x330   : > { %v2157_v49 = vmax.f32 %v2115_v55, 0.0 }
 0x331   : > { %2232 = vst [vmem:[#allocation3] sm:$0xff] %v2200_v59 }
 0x332   : > { %v2203_v8 = vpack.c.bf16 %v2157_v49, %v2157_v49  ;;  %v2016_v51 = vpop.f32.mrf.mxu3 }
 0x333   : > { %v2017_v52 = vadd.f32 %v2016_v51, %v4760_v38 }
 0x334   : > { %2235 = vst [vmem:[#allocation3 + $0x14] sm:$0xf] %v2203_v8  ;;  %v2068_v53 = vpop.f32.mrf.mxu0 }
 0x335   : > { %v2155_v56 = vmax.f32 %v2017_v52, 0.0  ;;  %v2117_v57 = vpop.f32.mrf.mxu1  ;;  %v2069_v1 = vadd.f32 %v2068_v53, %v4757_v34 }
 0x336   : > { %v2118_v58 = vadd.f32 %v2117_v57, %v4755_v16 }
 0x337   : > { %v2202_v60 = vpack.c.bf16 %v2156_v54, %v2155_v56  ;;  %v2159_v33 = vmax.f32 %v2069_v1, 0.0 }
 0x338   : > { %v2160_v61 = vmax.f32 %v2118_v58, 0.0 }
 0x339   : > { %2234 = vst [vmem:[#allocation3 + $0xc] sm:$0xff] %v2202_v60 }
 0x33a   : > { %v2205_v19 = vpack.c.bf16 %v2160_v61, %v2160_v61  ;;  %v2019_v2 = vpop.f32.mrf.mxu3 }
 0x33b   : > { %v2020_v3 = vadd.f32 %v2019_v2, %v4760_v38 }
 0x33c   : > { %2237 = vst [vmem:[#allocation3 + $0x20] sm:$0xf] %v2205_v19  ;;  %v2070_v35 = vpop.f32.mrf.mxu0 }
 0x33d   : > { %v2158_v4 = vmax.f32 %v2020_v3, 0.0  ;;  %v2119_v5 = vpop.f32.mrf.mxu1  ;;  %v2071_v10 = vadd.f32 %v2070_v35, %v4757_v34 }
 0x33e   : > { %v2120_v6 = vadd.f32 %v2119_v5, %v4755_v16 }
 0x33f   : > { %v2204_v7 = vpack.c.bf16 %v2159_v33, %v2158_v4  ;;  %v2162_v0 = vmax.f32 %v2071_v10, 0.0 }
 0x340   : > { %v2163_v9 = vmax.f32 %v2120_v6, 0.0 }
 0x341   : > { %2236 = vst [vmem:[#allocation3 + $0x18] sm:$0xff] %v2204_v7 }
 0x342   : > { %v2207_v11 = vpack.c.bf16 %v2163_v9, %v2163_v9  ;;  %v2021_v12 = vpop.f32.mrf.mxu3 }
 0x343   : > { %v2022_v14 = vadd.f32 %v2021_v12, %v4760_v38 }
 0x344   : > { %2239 = vst [vmem:[#allocation3 + $0x2c] sm:$0xf] %v2207_v11  ;;  %v2073_v15 = vpop.f32.mrf.mxu0 }
 0x345   : > { %v2161_v47 = vmax.f32 %v2022_v14, 0.0  ;;  %v2122_v17 = vpop.f32.mrf.mxu1  ;;  %v2074_v21 = vadd.f32 %v2073_v15, %v4757_v34 }
 0x346   : > { %v2123_v18 = vadd.f32 %v2122_v17, %v4755_v16 }
 0x347   : > { %v2206_v20 = vpack.c.bf16 %v2162_v0, %v2161_v47  ;;  %v2165_v28 = vmax.f32 %v2074_v21, 0.0 }
 0x348   : > { %v2166_v62 = vmax.f32 %v2123_v18, 0.0 }
 0x349   : > { %2238 = vst [vmem:[#allocation3 + $0x24] sm:$0xff] %v2206_v20 }
 0x34a   : > { %v2209_v22 = vpack.c.bf16 %v2166_v62, %v2166_v62  ;;  %v2024_v23 = vpop.f32.mrf.mxu3 }
 0x34b   : > { %v2025_v26 = vadd.f32 %v2024_v23, %v4760_v38 }
 0x34c   : > { %2241 = vst [vmem:[#allocation3 + $0x38] sm:$0xf] %v2209_v22  ;;  %v2075_v27 = vpop.f32.mrf.mxu0 }
 0x34d   : > { %v2164_v29 = vmax.f32 %v2025_v26, 0.0  ;;  %v2124_v30 = vpop.f32.mrf.mxu1  ;;  %v2076_v25 = vadd.f32 %v2075_v27, %v4757_v34 }
 0x34e   : > { %v2125_v24 = vadd.f32 %v2124_v30, %v4755_v16 }
 0x34f   : > { %v2208_v31 = vpack.c.bf16 %v2165_v28, %v2164_v29  ;;  %v2168_v39 = vmax.f32 %v2076_v25, 0.0 }
 0x350   : > { %v2169_v13 = vmax.f32 %v2125_v24, 0.0 }
 0x351   : > { %2240 = vst [vmem:[#allocation3 + $0x30] sm:$0xff] %v2208_v31 }
 0x352   : > { %v2211_v63 = vpack.c.bf16 %v2169_v13, %v2169_v13  ;;  %v2026_v32 = vpop.f32.mrf.mxu3 }
 0x353   : > { %v2027_v36 = vadd.f32 %v2026_v32, %v4760_v38 }
 0x354   : > { %2243 = vst [vmem:[#allocation3 + $0x44] sm:$0xf] %v2211_v63  ;;  %v2078_v37 = vpop.f32.mrf.mxu0 }
 0x355   : > { %v2167_v40 = vmax.f32 %v2027_v36, 0.0  ;;  %v2127_v41 = vpop.f32.mrf.mxu1  ;;  %v2079_v45 = vadd.f32 %v2078_v37, %v4757_v34 }
 0x356   : > { %v2128_v42 = vadd.f32 %v2127_v41, %v4755_v16 }
 0x357   : > { %v2210_v43 = vpack.c.bf16 %v2168_v39, %v2167_v40  ;;  %v2171_v49 = vmax.f32 %v2079_v45, 0.0 }
 0x358   : > { %v2172_v44 = vmax.f32 %v2128_v42, 0.0 }
 0x359   : > { %2242 = vst [vmem:[#allocation3 + $0x3c] sm:$0xff] %v2210_v43 }
 0x35a   : > { %v2213_v46 = vpack.c.bf16 %v2172_v44, %v2172_v44  ;;  %v2029_v48 = vpop.f32.mrf.mxu3 }
 0x35b   : > { %v2030_v55 = vadd.f32 %v2029_v48, %v4760_v38 }
 0x35c   : > { %2245 = vst [vmem:[#allocation3 + $0x50] sm:$0xf] %v2213_v46  ;;  %v2080_v59 = vpop.f32.mrf.mxu0 }
 0x35d   : > { %v2170_v50 = vmax.f32 %v2030_v55, 0.0  ;;  %v2129_v8 = vpop.f32.mrf.mxu1  ;;  %v2081_v54 = vadd.f32 %v2080_v59, %v4757_v34 }
 0x35e   : > { %v2130_v51 = vadd.f32 %v2129_v8, %v4755_v16 }
 0x35f   : > { %v2212_v52 = vpack.c.bf16 %v2171_v49, %v2170_v50  ;;  %v2174_v61 = vmax.f32 %v2081_v54, 0.0 }
 0x360   : > { %v2175_v53 = vmax.f32 %v2130_v51, 0.0 }
 0x361   : > { %2244 = vst [vmem:[#allocation3 + $0x48] sm:$0xff] %v2212_v52 }
 0x362   : > { %v2215_v56 = vpack.c.bf16 %v2175_v53, %v2175_v53  ;;  %v2031_v57 = vpop.f32.mrf.mxu3 }
 0x363   : > { %v2032_v58 = vadd.f32 %v2031_v57, %v4760_v38 }
 0x364   : > { %2247 = vst [vmem:[#allocation3 + $0x5c] sm:$0xf] %v2215_v56  ;;  %v2083_v60 = vpop.f32.mrf.mxu0 }
 0x365   : > { %v2173_v1 = vmax.f32 %v2032_v58, 0.0  ;;  %v2132_v19 = vpop.f32.mrf.mxu1  ;;  %v2084_v33 = vadd.f32 %v2083_v60, %v4757_v34 }
 0x366   : > { %v2133_v2 = vadd.f32 %v2132_v19, %v4755_v16 }
 0x367   : > { %v2214_v3 = vpack.c.bf16 %v2174_v61, %v2173_v1  ;;  %v2177_v9 = vmax.f32 %v2084_v33, 0.0 }
 0x368   : > { %v2178_v35 = vmax.f32 %v2133_v2, 0.0 }
 0x369   : > { %2246 = vst [vmem:[#allocation3 + $0x54] sm:$0xff] %v2214_v3 }
 0x36a   : > { %v2217_v4 = vpack.c.bf16 %v2178_v35, %v2178_v35  ;;  %v2034_v5 = vpop.f32.mrf.mxu3 }
 0x36b   : > { %v2035_v6 = vadd.f32 %v2034_v5, %v4760_v38 }
 0x36c   : > { %2249 = vst [vmem:[#allocation3 + $0x68] sm:$0xf] %v2217_v4  ;;  %v2085_v7 = vpop.f32.mrf.mxu0 }
 0x36d   : > { %v2176_v10 = vmax.f32 %v2035_v6, 0.0  ;;  %v2134_v11 = vpop.f32.mrf.mxu1  ;;  %v2086_v0 = vadd.f32 %v2085_v7, %v4757_v34 }
 0x36e   : > { %v2135_v12 = vadd.f32 %v2134_v11, %v4755_v16 }
 0x36f   : > { %v2216_v14 = vpack.c.bf16 %v2177_v9, %v2176_v10  ;;  %v2180_v62 = vmax.f32 %v2086_v0, 0.0 }
 0x370   : > { %v2181_v15 = vmax.f32 %v2135_v12, 0.0 }
 0x371   : > { %2248 = vst [vmem:[#allocation3 + $0x60] sm:$0xff] %v2216_v14 }
 0x372   : > { %v2219_v47 = vpack.c.bf16 %v2181_v15, %v2181_v15  ;;  %v2036_v17 = vpop.f32.mrf.mxu3 }
 0x373   : > { %v2037_v18 = vadd.f32 %v2036_v17, %v4760_v38 }
 0x374   : > { %2251 = vst [vmem:[#allocation3 + $0x74] sm:$0xf] %v2219_v47  ;;  %v2088_v20 = vpop.f32.mrf.mxu0 }
 0x375   : > { %v2179_v21 = vmax.f32 %v2037_v18, 0.0  ;;  %v2137_v22 = vpop.f32.mrf.mxu1  ;;  %v2089_v28 = vadd.f32 %v2088_v20, %v4757_v34 }
 0x376   : > { %v2138_v23 = vadd.f32 %v2137_v22, %v4755_v16 }
 0x377   : > { %v2218_v26 = vpack.c.bf16 %v2180_v62, %v2179_v21  ;;  %v2183_v13 = vmax.f32 %v2089_v28, 0.0 }
 0x378   : > { %v2184_v27 = vmax.f32 %v2138_v23, 0.0 }
 0x379   : > { %2250 = vst [vmem:[#allocation3 + $0x6c] sm:$0xff] %v2218_v26 }
 0x37a   : > { %v2221_v29 = vpack.c.bf16 %v2184_v27, %v2184_v27  ;;  %v2039_v30 = vpop.f32.mrf.mxu3 }
 0x37b   : > { %v2040_v24 = vadd.f32 %v2039_v30, %v4760_v38 }
 0x37c   : > { %2253 = vst [vmem:[#allocation3 + $0x80] sm:$0xf] %v2221_v29  ;;  %v2090_v31 = vpop.f32.mrf.mxu0 }
 0x37d   : > { %v2182_v25 = vmax.f32 %v2040_v24, 0.0  ;;  %v2139_v63 = vpop.f32.mrf.mxu1  ;;  %v2091_v39 = vadd.f32 %v2090_v31, %v4757_v34 }
 0x37e   : > { %v2140_v32 = vadd.f32 %v2139_v63, %v4755_v16 }
 0x37f   : > { %v2220_v36 = vpack.c.bf16 %v2183_v13, %v2182_v25  ;;  %v2186_v44 = vmax.f32 %v2091_v39, 0.0 }
 0x380   : > { %v2187_v37 = vmax.f32 %v2140_v32, 0.0 }
 0x381   : > { %2252 = vst [vmem:[#allocation3 + $0x78] sm:$0xff] %v2220_v36 }
 0x382   : > { %v2223_v40 = vpack.c.bf16 %v2187_v37, %v2187_v37  ;;  %v2041_v41 = vpop.f32.mrf.mxu3 }
 0x383   : > { %v2042_v42 = vadd.f32 %v2041_v41, %v4760_v38 }
 0x384   : > { %2255 = vst [vmem:[#allocation3 + $0x8c] sm:$0xf] %v2223_v40  ;;  %v2093_v43 = vpop.f32.mrf.mxu0 }
 0x385   : > { %v2185_v45 = vmax.f32 %v2042_v42, 0.0  ;;  %v2142_v46 = vpop.f32.mrf.mxu1  ;;  %v2094_v49 = vadd.f32 %v2093_v43, %v4757_v34 }
 0x386   : > { %v2143_v48 = vadd.f32 %v2142_v46, %v4755_v16 }
 0x387   : > { %v2222_v55 = vpack.c.bf16 %v2186_v44, %v2185_v45  ;;  %v2189_v53 = vmax.f32 %v2094_v49, 0.0 }
 0x388   : > { %v2190_v59 = vmax.f32 %v2143_v48, 0.0 }
 0x389   : > { %2254 = vst [vmem:[#allocation3 + $0x84] sm:$0xff] %v2222_v55 }
 0x38a   : > { %v2225_v50 = vpack.c.bf16 %v2190_v59, %v2190_v59  ;;  %v2044_v8 = vpop.f32.mrf.mxu3 }
 0x38b   : > { %v2045_v51 = vadd.f32 %v2044_v8, %v4760_v38 }
 0x38c   : > { %2257 = vst [vmem:[#allocation3 + $0x98] sm:$0xf] %v2225_v50  ;;  %v2095_v52 = vpop.f32.mrf.mxu0 }
 0x38d   : > { %v2188_v54 = vmax.f32 %v2045_v51, 0.0  ;;  %v2144_v56 = vpop.f32.mrf.mxu1  ;;  %v2096_v61 = vadd.f32 %v2095_v52, %v4757_v34 }
 0x38e   : > { %v2145_v57 = vadd.f32 %v2144_v56, %v4755_v16 }
 0x38f   : > { %v2224_v58 = vpack.c.bf16 %v2189_v53, %v2188_v54  ;;  %v2192_v35 = vmax.f32 %v2096_v61, 0.0 }
 0x390   : > { %v2193_v60 = vmax.f32 %v2145_v57, 0.0 }
 0x391   : > { %2256 = vst [vmem:[#allocation3 + $0x90] sm:$0xff] %v2224_v58 }
 0x392   : > { %v2227_v1 = vpack.c.bf16 %v2193_v60, %v2193_v60  ;;  %v2046_v19 = vpop.f32.mrf.mxu3 }
 0x393   : > { %v2047_v2 = vadd.f32 %v2046_v19, %v4760_v38 }
 0x394   : > { %2259 = vst [vmem:[#allocation3 + $0xa4] sm:$0xf] %v2227_v1  ;;  %v2098_v3 = vpop.f32.mrf.mxu0 }
 0x395   : > { %v2191_v33 = vmax.f32 %v2047_v2, 0.0  ;;  %v2147_v4 = vpop.f32.mrf.mxu1  ;;  %v2099_v9 = vadd.f32 %v2098_v3, %v4757_v34 }
 0x396   : > { %v2148_v5 = vadd.f32 %v2147_v4, %v4755_v16 }
 0x397   : > { %v2226_v6 = vpack.c.bf16 %v2192_v35, %v2191_v33  ;;  %v2195_v14 = vmax.f32 %v2099_v9, 0.0 }
 0x398   : > { %v2196_v7 = vmax.f32 %v2148_v5, 0.0 }
 0x399   : > { %2258 = vst [vmem:[#allocation3 + $0x9c] sm:$0xff] %v2226_v6 }
 0x39a   : > { %v2229_v10 = vpack.c.bf16 %v2196_v7, %v2196_v7  ;;  %v2049_v11 = vpop.f32.mrf.mxu3 }
 0x39b   : > { %v2050_v12 = vadd.f32 %v2049_v11, %v4760_v38 }
 0x39c   : > { %2261 = vst [vmem:[#allocation3 + $0xb0] sm:$0xf] %v2229_v10  ;;  %v2100_v47 = vpop.f32.mrf.mxu0 }
 0x39d   : > { %v2194_v15 = vmax.f32 %v2050_v12, 0.0  ;;  %v2149_v0 = vpop.f32.mrf.mxu1  ;;  %v2101_v62 = vadd.f32 %v2100_v47, %v4757_v34 }
 0x39e   : > { %v2150_v17 = vadd.f32 %v2149_v0, %v4755_v16 }
 0x39f   : > { %v2228_v18 = vpack.c.bf16 %v2195_v14, %v2194_v15  ;;  %v2198_v26 = vmax.f32 %v2101_v62, 0.0 }
 0x3a0   : > { %v2199_v20 = vmax.f32 %v2150_v17, 0.0 }
 0x3a1   : > { %2260 = vst [vmem:[#allocation3 + $0xa8] sm:$0xff] %v2228_v18 }
 0x3a2   : > { %v2231_v21 = vpack.c.bf16 %v2199_v20, %v2199_v20  ;;  %v2051_v22 = vpop.f32.mrf.mxu3 }
 0x3a3   : > { %v2052_v23 = vadd.f32 %v2051_v22, %v4760_v38 }
 0x3a4   : > { %2263 = vst [vmem:[#allocation3 + $0xbc] sm:$0xf] %v2231_v21 }
 0x3a5   : > { %v2197_v27 = vmax.f32 %v2052_v23, 0.0 }
 0x3a7   : > { %v2230_v28 = vpack.c.bf16 %v2198_v26, %v2197_v27 }
 0x3a9   : > { %2262 = vst [vmem:[#allocation3 + $0xb4] sm:$0xff] %v2230_v28 }
 0x3aa PF: > { %p3432_p2 = scmp.lt.s32.totalorder %s4181_s19, 3 }
 0x3ac   : > { %2267 = sbr.rel (%p3432_p2) target bundleno = 1204 (0x4b4), region = 125 }
 0x3b1   : > { %v3745_v16 = vld [vmem:[%s4432_s20 + $0x38] sm:$0xff]  ;;  %v3744_v29 = vld [vmem:[%s4432_s20 + $0x30] sm:$0xff]  ;;  %v3743_v31 = vld [vmem:[%s4432_s20 + $0x28] sm:$0xff] }
 0x3b2   : > { %v4812_v34 = vld [vmem:[%s4432_s20 + $0x78] sm:$0xff]  ;;  %2624 = vmatpush.bf16.msra.mxu0 %v3745_v16  ;;  %3896 = vmatpush.bf16.msra.mxu3 %v3745_v16  ;;  %v4821_v30 = vld [vmem:[%s4432_s20 + $0x70] sm:$0xff]  ;;  %v3751_v13 = vld [vmem:[%s4432_s20 + $0x68] sm:$0xff] }
 0x3b3   : > { %v4815_v38 = vld [vmem:[%s4432_s20 + $0xb8] sm:$0xff]  ;;  %2673 = vmatpush.bf16.msra.mxu1 %v4812_v34  ;;  %v4824_v24 = vld [vmem:[%s4432_s20 + $0xb0] sm:$0xff]  ;;  %v4831_v25 = vld [vmem:[%s4432_s20 + $0xa8] sm:$0xff] }
 0x3b4   : > { %2722 = vmatpush.bf16.msra.mxu2 %v4815_v38  ;;  %v3742_v63 = vld [vmem:[%s4432_s20 + $0x20] sm:$0xff]  ;;  %v3741_v37 = vld [vmem:[%s4432_s20 + $0x18] sm:$0xff]  ;;  %v3740_v41 = vld [vmem:[%s4432_s20 + $0x10] sm:$0xff] }
 0x3b5   : > { %v3750_v32 = vld [vmem:[%s4432_s20 + $0x60] sm:$0xff]  ;;  %v3749_v39 = vld [vmem:[%s4432_s20 + $0x58] sm:$0xff]  ;;  %v3748_v42 = vld [vmem:[%s4432_s20 + $0x50] sm:$0xff] }
 0x3b6   : > { %2625 = vmatpush.bf16.msra.mxu0 %v3744_v29  ;;  %3897 = vmatpush.bf16.msra.mxu3 %v3744_v29  ;;  %v4837_v36 = vld [vmem:[%s4432_s20 + $0xa0] sm:$0xff]  ;;  %v4843_v40 = vld [vmem:[%s4432_s20 + $0x98] sm:$0xff]  ;;  %v4849_v43 = vld [vmem:[%s4432_s20 + $0x90] sm:$0xff] }
 0x3b7   : > { %2674 = vmatpush.bf16.msra.mxu1 %v4821_v30  ;;  %v3739_v44 = vld [vmem:[%s4432_s20 + $0x8] sm:$0xff]  ;;  %v3738_v48 = vld [vmem:[%s4432_s20] sm:$0xff]  ;;  %v3507_v8 = vld [vmem:[#allocation3 + $0x90] sm:$0xf] }
 0x3b8   : > { %2723 = vmatpush.bf16.msra.mxu2 %v4824_v24  ;;  %v3747_v45 = vld [vmem:[%s4432_s20 + $0x48] sm:$0xff]  ;;  %v3746_v55 = vld [vmem:[%s4432_s20 + $0x40] sm:$0xff]  ;;  %v3733_v51 = vld [vmem:[#allocation3 + $0x98] sm:$0xf0] }
 0x3b9   : > { %v4855_v46 = vld [vmem:[%s4432_s20 + $0x88] sm:$0xff]  ;;  %v4860_v59 = vld [vmem:[%s4432_s20 + $0x80] sm:$0xff]  ;;  %v3437_v53 = vld [vmem:[#allocation3 + $0xc] sm:$0xf0]  ;;  %v3508_v58 = vor.u32 %v3733_v51, %v3507_v8 }
 0x3ba   : > { %2626 = vmatpush.bf16.msra.mxu0 %v3743_v31  ;;  %3898 = vmatpush.bf16.msra.mxu3 %v3743_v31  ;;  %v3435_v49 = vld [vmem:[#allocation3] sm:$0xf]  ;;  %v3715_v50 = vld [vmem:[#allocation3 + $0x8] sm:$0xf0]  ;;  %v3714_v52 = vld [vmem:[#allocation3 + $0x4] sm:$0xf] }
 0x3bb   : > { %2675 = vmatpush.bf16.msra.mxu1 %v3751_v13  ;;  %v3443_v54 = vld [vmem:[#allocation3 + $0x8] sm:$0xf]  ;;  %v3716_v56 = vld [vmem:[#allocation3 + $0x10] sm:$0xf0]  ;;  %v3436_v57 = vor.u32 %v3715_v50, %v3435_v49  ;;  %v3440_v60 = vor.u32 %v3714_v52, %v3437_v53  ;;  %v3447_v1 = vld [vmem:[#allocation3 + $0x18] sm:$0xf] }
 0x3bc   : > { %2724 = vmatpush.bf16.msra.mxu2 %v4831_v25  ;;  %v3444_v61 = vor.u32 %v3716_v56, %v3443_v54  ;;  %v3718_v19 = vld [vmem:[#allocation3 + $0x20] sm:$0xf0]  ;;  %v3519_v2 = vld [vmem:[#allocation3 + $0xa8] sm:$0xf]  ;;  %v3736_v3 = vld [vmem:[#allocation3 + $0xb0] sm:$0xf0] }
 0x3bd   : > { %v3717_v35 = vld [vmem:[#allocation3 + $0x1c] sm:$0xf]  ;;  %v3449_v33 = vld [vmem:[#allocation3 + $0x24] sm:$0xf0]  ;;  %v3455_v4 = vld [vmem:[#allocation3 + $0x20] sm:$0xf]  ;;  %v3448_v6 = vor.u32 %v3718_v19, %v3447_v1  ;;  %v3520_v7 = vor.u32 %v3736_v3, %v3519_v2 }
 0x3be   : > { %2627 = vmatpush.bf16.msra.mxu0 %v3742_v63  ;;  %3899 = vmatpush.bf16.msra.mxu3 %v3742_v63  ;;  %v3719_v5 = vld [vmem:[#allocation3 + $0x28] sm:$0xf0]  ;;  %v3452_v9 = vor.u32 %v3717_v35, %v3449_v33  ;;  %v3459_v11 = vld [vmem:[#allocation3 + $0x30] sm:$0xf]  ;;  %v3721_v12 = vld [vmem:[#allocation3 + $0x38] sm:$0xf0] }
 0x3bf   : > { %2676 = vmatpush.bf16.msra.mxu1 %v3750_v32  ;;  %v3456_v10 = vor.u32 %v3719_v5, %v3455_v4  ;;  %v3720_v14 = vld [vmem:[#allocation3 + $0x34] sm:$0xf]  ;;  %v3509_v0 = vld [vmem:[#allocation3 + $0x9c] sm:$0xf0]  ;;  %v3467_v17 = vld [vmem:[#allocation3 + $0x38] sm:$0xf]  ;;  %v3460_v20 = vor.u32 %v3721_v12, %v3459_v11 }
 0x3c0   : > { %2725 = vmatpush.bf16.msra.mxu2 %v4837_v36  ;;  %v3732_v15 = vld [vmem:[#allocation3 + $0x94] sm:$0xf]  ;;  %v3461_v47 = vld [vmem:[#allocation3 + $0x3c] sm:$0xf0]  ;;  %v3722_v18 = vld [vmem:[#allocation3 + $0x40] sm:$0xf0] }
 0x3c1   : > { %v3512_v62 = vor.u32 %v3732_v15, %v3509_v0  ;;  %v3464_v21 = vor.u32 %v3720_v14, %v3461_v47  ;;  %v3468_v22 = vor.u32 %v3722_v18, %v3467_v17  ;;  %v3471_v23 = vld [vmem:[#allocation3 + $0x48] sm:$0xf]  ;;  %v3724_v26 = vld [vmem:[#allocation3 + $0x50] sm:$0xf0]  ;;  %v3723_v27 = vld [vmem:[#allocation3 + $0x4c] sm:$0xf] }
 0x3c2   : > { %2628 = vmatpush.bf16.msra.mxu0 %v3741_v37  ;;  %3900 = vmatpush.bf16.msra.mxu3 %v3741_v37  ;;  %v3735_v28 = vld [vmem:[#allocation3 + $0xac] sm:$0xf]  ;;  %v3521_v16 = vld [vmem:[#allocation3 + $0xb4] sm:$0xf0]  ;;  %v3479_v29 = vld [vmem:[#allocation3 + $0x50] sm:$0xf] }
 0x3c3   : > { %2677 = vmatpush.bf16.msra.mxu1 %v3749_v39  ;;  %v3524_v31 = vor.u32 %v3735_v28, %v3521_v16  ;;  %v3734_v37 = vld [vmem:[#allocation3 + $0xa0] sm:$0xf0]  ;;  %v3527_v49 = vld [vmem:[#allocation3 + $0xb0] sm:$0xf]  ;;  %v3737_v50 = vld [vmem:[#allocation3 + $0xb8] sm:$0xf0] }
 0x3c4   : > { %2726 = vmatpush.bf16.msra.mxu2 %v4843_v40  ;;  %v3497_v8 = vld [vmem:[#allocation3 + $0x84] sm:$0xf0]  ;;  %v3503_v51 = vld [vmem:[#allocation3 + $0x80] sm:$0xf]  ;;  %v3528_v53 = vor.u32 %v3737_v50, %v3527_v49 }
 0x3c6   : > { %2629 = vmatpush.bf16.msra.mxu0 %v3740_v41  ;;  %3901 = vmatpush.bf16.msra.mxu3 %v3740_v41  ;;  %v3491_v41 = vld [vmem:[#allocation3 + $0x68] sm:$0xf] }
 0x3c7   : > { %2678 = vmatpush.bf16.msra.mxu1 %v3748_v42 }
 0x3c8   : > { %2727 = vmatpush.bf16.msra.mxu2 %v4849_v43 }
 0x3ca   : > { %2630 = vmatpush.bf16.msra.mxu0 %v3739_v44  ;;  %3902 = vmatpush.bf16.msra.mxu3 %v3739_v44 }
 0x3cb   : > { %2679 = vmatpush.bf16.msra.mxu1 %v3747_v45 }
 0x3cc   : > { %2728 = vmatpush.bf16.msra.mxu2 %v4855_v46 }
 0x3ce   : > { %2631 = vmatpush.bf16.msra.mxu0 %v3738_v48  ;;  %3903 = vmatpush.bf16.msra.mxu3 %v3738_v48 }
 0x3cf   : > { %2680 = vmatpush.bf16.msra.mxu1 %v3746_v55 }
 0x3d0   : > { %2729 = vmatpush.bf16.msra.mxu2 %v4860_v59 }
 0x3d1   : > { %2632 = vmatmul.bf16.vlgmr.msra.gmra.mxu0 %v3436_v57  ;;  %2662 = vmatmul.bf16.vlgmr.msra.gmra.mxu3 %v3508_v58 }
 0x3d2   : > { %3904 = vmatpush.bf16.msrb.mxu3 %v4812_v34  ;;  %2681 = vmatmul.bf16.vlgmr.msra.gmra.mxu1 %v3440_v60  ;;  %v3473_v34 = vld [vmem:[#allocation3 + $0x54] sm:$0xf0]  ;;  %v4879_v60 = vld [vmem:[%s649_s6] ss:$0 sm:$0xff] }
 0x3d3   : > { %2730 = vmatmul.bf16.vlgmr.msra.gmra.mxu2 %v3444_v61 }
 0x3d6   : > { %3905 = vmatpush.bf16.msrb.mxu3 %v4821_v30  ;;  %v3472_v30 = vor.u32 %v3724_v26, %v3471_v23 }
 0x3da   : > { %3906 = vmatpush.bf16.msrb.mxu3 %v3751_v13  ;;  %v3476_v13 = vor.u32 %v3723_v27, %v3473_v34 }
 0x3de   : > { %3907 = vmatpush.bf16.msrb.mxu3 %v3750_v32  ;;  %v3726_v32 = vld [vmem:[#allocation3 + $0x64] sm:$0xf] }
 0x3e1   : > { %2637 = vmatmul.bf16.gmra.mxu0 %v3448_v6  ;;  %2667 = vmatmul.bf16.gmra.mxu3 %v3520_v7 }
 0x3e2   : > { %3908 = vmatpush.bf16.msrb.mxu3 %v3749_v39  ;;  %2686 = vmatmul.bf16.gmra.mxu1 %v3452_v9  ;;  %v3485_v39 = vld [vmem:[#allocation3 + $0x6c] sm:$0xf0] }
 0x3e3   : > { %2735 = vmatmul.bf16.gmra.mxu2 %v3456_v10 }
 0x3e6   : > { %3909 = vmatpush.bf16.msrb.mxu3 %v3748_v42  ;;  %v3728_v42 = vld [vmem:[#allocation3 + $0x70] sm:$0xf0] }
 0x3e7   : > { %v3492_v48 = vor.u32 %v3728_v42, %v3491_v41 }
 0x3ea   : > { %3910 = vmatpush.bf16.msrb.mxu3 %v3747_v45  ;;  %v3488_v45 = vor.u32 %v3726_v32, %v3485_v39 }
 0x3ee   : > { %3911 = vmatpush.bf16.msrb.mxu3 %v3746_v55  ;;  %v3729_v55 = vld [vmem:[#allocation3 + $0x7c] sm:$0xf] }
 0x3ef   : > { %v3500_v54 = vor.u32 %v3729_v55, %v3497_v8 }
 0x3f1   : > { %2642 = vmatmul.bf16.gmra.mxu0 %v3460_v20  ;;  %2711 = vmatmul.bf16.vlgmr.msrb.gmra.mxu3 %v3512_v62 }
 0x3f2   : > { %3912 = vmatpush.bf16.msra.mxu3 %v4815_v38  ;;  %2691 = vmatmul.bf16.gmra.mxu1 %v3464_v21  ;;  %v3725_v38 = vld [vmem:[#allocation3 + $0x58] sm:$0xf0] }
 0x3f3   : > { %2740 = vmatmul.bf16.gmra.mxu2 %v3468_v22  ;;  %v3480_v63 = vor.u32 %v3725_v38, %v3479_v29 }
 0x3f6   : > { %3913 = vmatpush.bf16.msra.mxu3 %v4824_v24  ;;  %v3483_v24 = vld [vmem:[#allocation3 + $0x60] sm:$0xf] }
 0x3fa   : > { %3914 = vmatpush.bf16.msra.mxu3 %v4831_v25  ;;  %v3727_v25 = vld [vmem:[#allocation3 + $0x68] sm:$0xf0] }
 0x3fb   : > { %v3484_v44 = vor.u32 %v3727_v25, %v3483_v24 }
 0x3fe   : > { %3915 = vmatpush.bf16.msra.mxu3 %v4837_v36  ;;  %v3515_v36 = vld [vmem:[#allocation3 + $0x98] sm:$0xf] }
 0x401   : > { %2647 = vmatmul.bf16.gmra.mxu0 %v3472_v30  ;;  %2716 = vmatmul.bf16.gmra.mxu3 %v3524_v31 }
 0x402   : > { %3916 = vmatpush.bf16.msra.mxu3 %v4843_v40  ;;  %2696 = vmatmul.bf16.gmra.mxu1 %v3476_v13  ;;  %v3516_v40 = vor.u32 %v3734_v37, %v3515_v36 }
 0x403   : > { %2745 = vmatmul.bf16.gmra.mxu2 %v3480_v63 }
 0x406   : > { %3917 = vmatpush.bf16.msra.mxu3 %v4849_v43  ;;  %v3495_v43 = vld [vmem:[#allocation3 + $0x78] sm:$0xf] }
 0x40a   : > { %3918 = vmatpush.bf16.msra.mxu3 %v4855_v46  ;;  %v3730_v46 = vld [vmem:[#allocation3 + $0x80] sm:$0xf0] }
 0x40b   : > { %v3496_v52 = vor.u32 %v3730_v46, %v3495_v43 }
 0x40e   : > { %3919 = vmatpush.bf16.msra.mxu3 %v4860_v59  ;;  %v3731_v59 = vld [vmem:[#allocation3 + $0x88] sm:$0xf0] }
 0x40f   : > { %v3504_v56 = vor.u32 %v3731_v59, %v3503_v51 }
 0x411   : > { %2652 = vmatmul.bf16.gmra.mxu0 %v3484_v44  ;;  %2760 = vmatmul.bf16.vlgmr.msra.gmra.mxu3 %v3516_v40 }
 0x412   : > { %2701 = vmatmul.bf16.gmra.mxu1 %v3488_v45 }
 0x413   : > { %2750 = vmatmul.bf16.gmra.mxu2 %v3492_v48 }
 0x421   : > { %2657 = vmatmul.bf16.gmra.mxu0 %v3496_v52  ;;  %2765 = vmatmul.bf16.gmra.mxu3 %v3528_v53 }
 0x422   : > { %2706 = vmatmul.bf16.gmra.mxu1 %v3500_v54 }
 0x423   : > { %2755 = vmatmul.bf16.gmra.mxu2 %v3504_v56 }
 0x44e   : > { %v2633_v57 = vpop.f32.mrf.mxu0 }
 0x44f   : > { %v2682_v58 = vpop.f32.mrf.mxu1  ;;  %v2634_v19 = vadd.f32 %v4879_v60, %v2633_v57 }
 0x451   : > { %v2683_v33 = vadd.f32 %v2682_v58, %v2634_v19 }
 0x454   : > { %v4881_v61 = vpop.f32.mrf.mxu3 }
 0x456   : > { %v2731_v1 = vpop.f32.mrf.mxu2  ;;  %v2635_v2 = vpop.f32.mrf.mxu0 }
 0x457   : > { %v2684_v3 = vpop.f32.mrf.mxu1  ;;  %v2636_v35 = vadd.f32 %v4879_v60, %v2635_v2  ;;  %v2732_v7 = vadd.f32 %v2731_v1, %v2683_v33 }
 0x459   : > { %v2685_v4 = vadd.f32 %v2684_v3, %v2636_v35  ;;  %v2664_v3 = vadd.f32 %v4879_v60, %v4881_v61 }
 0x45c   : > { %v4885_v5 = vpop.f32.mrf.mxu3 }
 0x45d   : > { %v2666_v35 = vadd.f32 %v4879_v60, %v4885_v5 }
 0x45e   : > { %v2733_v6 = vpop.f32.mrf.mxu2  ;;  %v2638_v10 = vpop.f32.mrf.mxu0 }
 0x45f   : > { %v2734_v9 = vadd.f32 %v2733_v6, %v2685_v4  ;;  %v2687_v11 = vpop.f32.mrf.mxu1  ;;  %v2639_v0 = vadd.f32 %v4879_v60, %v2638_v10 }
 0x461   : > { %v3805_v12 = vpack.c.bf16 %v2734_v9, %v2732_v7  ;;  %v2688_v20 = vadd.f32 %v2687_v11, %v2639_v0 }
 0x463   : > { %3806 = vst [vmem:[%s4448_s9] sm:$0xff] %v3805_v12  }
 0x464   : > { %v4888_v14 = vpop.f32.mrf.mxu3 }
 0x466   : > { %v2736_v15 = vpop.f32.mrf.mxu2  ;;  %v2640_v47 = vpop.f32.mrf.mxu0 }
 0x467   : > { %v2689_v17 = vpop.f32.mrf.mxu1  ;;  %v2641_v18 = vadd.f32 %v4879_v60, %v2640_v47  ;;  %v2737_v23 = vadd.f32 %v2736_v15, %v2688_v20 }
 0x469   : > { %v2690_v62 = vadd.f32 %v2689_v17, %v2641_v18 }
 0x46c   : > { %v4892_v21 = vpop.f32.mrf.mxu3 }
 0x46e   : > { %v2738_v22 = vpop.f32.mrf.mxu2  ;;  %v2643_v27 = vpop.f32.mrf.mxu0 }
 0x46f   : > { %v2739_v26 = vadd.f32 %v2738_v22, %v2690_v62  ;;  %v2692_v28 = vpop.f32.mrf.mxu1  ;;  %v2644_v38 = vadd.f32 %v4879_v60, %v2643_v27  ;;  %v2671_v27 = vadd.f32 %v4879_v60, %v4892_v21 }
 0x471   : > { %v3810_v16 = vpack.c.bf16 %v2739_v26, %v2737_v23  ;;  %v2693_v63 = vadd.f32 %v2692_v28, %v2644_v38  ;;  %v2669_v26 = vadd.f32 %v4879_v60, %v4888_v14 }
 0x473   : > { %3849 = vst [vmem:[%s4448_s9 + $0x8] sm:$0xff] %v3810_v16  }
 0x474   : > { %v2712_v34 = vpop.f32.mrf.mxu3 }
 0x475   : > { %v2713_v4 = vadd.f32 %v2712_v34, %v2664_v3 }
 0x476   : > { %v2741_v29 = vpop.f32.mrf.mxu2  ;;  %v2645_v30 = vpop.f32.mrf.mxu0 }
 0x477   : > { %v2694_v31 = vpop.f32.mrf.mxu1  ;;  %v2646_v13 = vadd.f32 %v4879_v60, %v2645_v30  ;;  %v2742_v36 = vadd.f32 %v2741_v29, %v2693_v63 }
 0x479   : > { %v2695_v24 = vadd.f32 %v2694_v31, %v2646_v13 }
 0x47c   : > { %v2714_v25 = vpop.f32.mrf.mxu3 }
 0x47d   : > { %v2715_v6 = vadd.f32 %v2714_v25, %v2666_v35 }
 0x47e   : > { %v2743_v32 = vpop.f32.mrf.mxu2  ;;  %v2648_v39 = vpop.f32.mrf.mxu0 }
 0x47f   : > { %v2744_v37 = vadd.f32 %v2743_v32, %v2695_v24  ;;  %v2697_v41 = vpop.f32.mrf.mxu1  ;;  %v2649_v45 = vadd.f32 %v4879_v60, %v2648_v39 }
 0x481   : > { %v3815_v42 = vpack.c.bf16 %v2744_v37, %v2742_v36  ;;  %v2698_v55 = vadd.f32 %v2697_v41, %v2649_v45 }
 0x483   : > { %3850 = vst [vmem:[%s4448_s9 + $0x10] sm:$0xff] %v3815_v42  }
 0x484   : > { %v2717_v44 = vpop.f32.mrf.mxu3 }
 0x485   : > { %v2718_v16 = vadd.f32 %v2717_v44, %v2669_v26 }
 0x486   : > { %v2746_v40 = vpop.f32.mrf.mxu2  ;;  %v2650_v48 = vpop.f32.mrf.mxu0 }
 0x487   : > { %v2699_v43 = vpop.f32.mrf.mxu1  ;;  %v2651_v46 = vadd.f32 %v4879_v60, %v2650_v48  ;;  %v2747_v51 = vadd.f32 %v2746_v40, %v2698_v55 }
 0x489   : > { %v2700_v49 = vadd.f32 %v2699_v43, %v2651_v46 }
 0x48c   : > { %v2719_v50 = vpop.f32.mrf.mxu3 }
 0x48d   : > { %v2720_v34 = vadd.f32 %v2719_v50, %v2671_v27 }
 0x48e   : > { %v2748_v8 = vpop.f32.mrf.mxu2  ;;  %v2653_v52 = vpop.f32.mrf.mxu0 }
 0x48f   : > { %v2749_v59 = vadd.f32 %v2748_v8, %v2700_v49  ;;  %v2702_v53 = vpop.f32.mrf.mxu1  ;;  %v2654_v58 = vadd.f32 %v4879_v60, %v2653_v52 }
 0x491   : > { %v3820_v54 = vpack.c.bf16 %v2749_v59, %v2747_v51  ;;  %v2703_v33 = vadd.f32 %v2702_v53, %v2654_v58 }
 0x493   : > { %3851 = vst [vmem:[%s4448_s9 + $0x18] sm:$0xff] %v3820_v54  }
 0x494   : > { %v2761_v56 = vpop.f32.mrf.mxu3 }
 0x495   : > { %v2762_v10 = vadd.f32 %v2761_v56, %v2713_v4 }
 0x496   : > { %v2751_v57 = vpop.f32.mrf.mxu2  ;;  %v2655_v1 = vpop.f32.mrf.mxu0 }
 0x497   : > { %v2704_v19 = vpop.f32.mrf.mxu1  ;;  %v2656_v2 = vadd.f32 %v4879_v60, %v2655_v1  ;;  %v2752_v15 = vadd.f32 %v2751_v57, %v2703_v33 }
 0x499   : > { %v2705_v7 = vadd.f32 %v2704_v19, %v2656_v2 }
 0x49c   : > { %v2763_v9 = vpop.f32.mrf.mxu3 }
 0x49d   : > { %v2764_v12 = vadd.f32 %v2763_v9, %v2715_v6 }
 0x49e   : > { %v2753_v11 = vpop.f32.mrf.mxu2  ;;  %v2658_v47 = vpop.f32.mrf.mxu0 }
 0x49f   : > { %v2754_v0 = vadd.f32 %v2753_v11, %v2705_v7  ;;  %v3835_v17 = vpack.c.bf16 %v2764_v12, %v2762_v10  ;;  %v2707_v20 = vpop.f32.mrf.mxu1  ;;  %v2659_v5 = vadd.f32 %v4879_v60, %v2658_v47 }
 0x4a1   : > { %v3825_v18 = vpack.c.bf16 %v2754_v0, %v2752_v15  ;;  %3854 = vst [vmem:[%s4448_s9 + $0x30] sm:$0xff] %v3835_v17   ;;  %v2708_v28 = vadd.f32 %v2707_v20, %v2659_v5 }
 0x4a3   : > { %3852 = vst [vmem:[%s4448_s9 + $0x20] sm:$0xff] %v3825_v18  }
 0x4a4   : > { %v2766_v61 = vpop.f32.mrf.mxu3 }
 0x4a5   : > { %v2767_v31 = vadd.f32 %v2766_v61, %v2718_v16 }
 0x4a6   : > { %v2756_v62 = vpop.f32.mrf.mxu2  ;;  %v2660_v22 = vpop.f32.mrf.mxu0 }
 0x4a7   : > { %v2661_v23 = vadd.f32 %v4879_v60, %v2660_v22  ;;  %v2709_v29 = vpop.f32.mrf.mxu1  ;;  %v2757_v24 = vadd.f32 %v2756_v62, %v2708_v28 }
 0x4a9   : > { %v2710_v38 = vadd.f32 %v2709_v29, %v2661_v23 }
 0x4ac   : > { %v2768_v30 = vpop.f32.mrf.mxu3 }
 0x4ad   : > { %v2769_v63 = vadd.f32 %v2768_v30, %v2720_v34 }
 0x4ae   : > { %v2758_v13 = vpop.f32.mrf.mxu2 }
 0x4af   : > { %v2759_v25 = vadd.f32 %v2758_v13, %v2710_v38  ;;  %v3840_v32 = vpack.c.bf16 %v2769_v63, %v2767_v31 }
 0x4b1   : > { %v3830_v36 = vpack.c.bf16 %v2759_v25, %v2757_v24  ;;  %3855 = vst [vmem:[%s4448_s9 + $0x38] sm:$0xff] %v3840_v32  }
 0x4b3   : > { %3853 = vst [vmem:[%s4448_s9 + $0x28] sm:$0xff] %v3830_v36  }
 0x4b4 PF: > { %2818 = sbr.rel (!%p4354_p3) target bundleno = 1228 (0x4cc), region = 133  ;;  %s3628_s6 = sshll.u32 (%p4354_p3), %s5035_s26, 2  ;;  %v2843_v60 = vld [vmem:[%s4448_s9] sm:$0xf] (%p4354_p3)  ;;  %v2845_v14 = vld [vmem:[%s4448_s9 + $0x4] sm:$0xf] (%p4354_p3) }
 0x4b5   : > { %s5016_s23 = sld [smem:[#allocation29_spill]] (%p4354_p3)  ;;  %v2847_v21 = vld [vmem:[%s4448_s9 + $0x8] sm:$0xf] (%p4354_p3)  ;;  %v2849_v37 = vld [vmem:[%s4448_s9 + $0xc] sm:$0xf] (%p4354_p3) }
 0x4b6   : > { %v2851_v39 = vld [vmem:[%s4448_s9 + $0x10] sm:$0xf] (%p4354_p3)  ;;  %v2853_v41 = vld [vmem:[%s4448_s9 + $0x14] sm:$0xf] (%p4354_p3)  ;;  %v2855_v42 = vld [vmem:[%s4448_s9 + $0x18] sm:$0xf] (%p4354_p3) }
 0x4b7   : > { %v2857_v44 = vld [vmem:[%s4448_s9 + $0x1c] sm:$0xf] (%p4354_p3)  ;;  %v2859_v40 = vld [vmem:[%s4448_s9 + $0x20] sm:$0xf] (%p4354_p3)  ;;  %v2861_v45 = vld [vmem:[%s4448_s9 + $0x24] sm:$0xf] (%p4354_p3) }
 0x4b8   : > { %v2867_v46 = vld [vmem:[%s4448_s9 + $0x30] sm:$0xf] (%p4354_p3)  ;;  %v2869_v55 = vld [vmem:[%s4448_s9 + $0x34] sm:$0xf] (%p4354_p3)  ;;  %v2871_v49 = vld [vmem:[%s4448_s9 + $0x38] sm:$0xf] (%p4354_p3) }
 0x4b9   : > { %v2873_v50 = vld [vmem:[%s4448_s9 + $0x3c] sm:$0xf] }
 0x4ba   : > { %v2863_v48 = vld [vmem:[%s4448_s9 + $0x28] sm:$0xf]  ;;  %v2865_v43 = vld [vmem:[%s4448_s9 + $0x2c] sm:$0xf] }
 0x4bb   : > { %s2826_s13 = scalar_lea.vmem %s5016_s23, %s3628_s6 }
 0x4bc   : > { %2844 = vst [vmem:[%s2826_s13] sm:$0xf] %v2843_v60 }
 0x4bd   : > { %2846 = vst [vmem:[%s2826_s13 + $0xc] sm:$0xf] %v2845_v14 }
 0x4be   : > { %2848 = vst [vmem:[%s2826_s13 + $0x18] sm:$0xf] %v2847_v21 }
 0x4bf   : > { %2850 = vst [vmem:[%s2826_s13 + $0x24] sm:$0xf] %v2849_v37 }
 0x4c0   : > { %2852 = vst [vmem:[%s2826_s13 + $0x30] sm:$0xf] %v2851_v39 }
 0x4c1   : > { %2854 = vst [vmem:[%s2826_s13 + $0x3c] sm:$0xf] %v2853_v41 }
 0x4c2   : > { %2856 = vst [vmem:[%s2826_s13 + $0x48] sm:$0xf] %v2855_v42 }
 0x4c3   : > { %2858 = vst [vmem:[%s2826_s13 + $0x54] sm:$0xf] %v2857_v44 }
 0x4c4   : > { %2860 = vst [vmem:[%s2826_s13 + $0x60] sm:$0xf] %v2859_v40 }
 0x4c5   : > { %2862 = vst [vmem:[%s2826_s13 + $0x6c] sm:$0xf] %v2861_v45 }
 0x4c6   : > { %2864 = vst [vmem:[%s2826_s13 + $0x78] sm:$0xf] %v2863_v48 }
 0x4c7   : > { %2866 = vst [vmem:[%s2826_s13 + $0x84] sm:$0xf] %v2865_v43 }
 0x4c8   : > { %2868 = vst [vmem:[%s2826_s13 + $0x90] sm:$0xf] %v2867_v46 }
 0x4c9   : > { %2870 = vst [vmem:[%s2826_s13 + $0x9c] sm:$0xf] %v2869_v55 }
 0x4ca   : > { %2872 = vst [vmem:[%s2826_s13 + $0xa8] sm:$0xf] %v2871_v49 }
 0x4cb   : > { %2874 = vst [vmem:[%s2826_s13 + $0xb4] sm:$0xf] %v2873_v50 }
 0x4cc PF: > { %s5017_s26 = sld [smem:[#allocation16_spill]]  ;;  %s5023_s13 = smov %s4161_s14 }
 0x4cd   : > { %s5018_s12 = sld [smem:[#allocation20_spill]]  ;;  %s5024_s14 = smov %s4165_s15 }
 0x4ce   : > { %s5019_s10 = sld [smem:[#allocation14_spill]]  ;;  %s5026_s16 = smov %s4173_s17 }
 0x4cf   : > { %s5020_s18 = sld [smem:[#allocation18_spill]] }
 0x4d0   : > { %s5021_s19 = sld [smem:[#allocation15_spill]] }
 0x4d1   : > { %s5022_s20 = sld [smem:[#allocation17_spill]] }
 0x4d2   : > { %s25_s21 = sadd.s32 1, %s5017_s26  }
 0x4d3   : > { %p22_p3 = scmp.ge.s32.totalorder %s25_s21, 8   ;;  %s5025_s15 = smov %s5018_s12 }
 0x4d4   : > { %s5027_s17 = smov %s5019_s10 }
 0x4d5   :  { %24 = sbr.rel (!%p22_p3) target bundleno = 17 (0x11), region = 232 }
 0x4da   :  { %2948 = vsyncpa [#allocation6], 1 }
 0x4db   :  { %2950 = vsyncpa [#allocation6 + $0x1], 1 }
 0x4dc   :  { %2951 = vsyncpa [#allocation8], 1 }

</bundles_post_ra>
